<compile_context>
chip_gen: v7x
topology: tpu7x:2x2x1
jax: 0.10.0
libtpu: 0.0.40
codegen_flags: <defaults>
</compile_context>

<pallas_src>
import functools

import jax
import jax.numpy as jnp
from jax import lax
from jax.experimental import pallas as pl
from jax.experimental.pallas import tpu as pltpu


def _round_up(v, m):
    return ((v + m - 1) // m) * m


def _pad_to(a, shape):
    pads = [(0, t - s) for s, t in zip(a.shape, shape)]
    return jnp.pad(a, pads)


# ---------------------------------------------------------------------------
# Fused, row-tiled kernel: conv1 + relu + conv2 + relu + mean-pool + linear
# grid = (layer, row_tile); layer 0 fills the h1 scratch, layer 1 consumes it
# and accumulates the pooled graph embeddings; the Linear head runs last.
# ---------------------------------------------------------------------------

def fused_gnn_kernel(a_ref, x_ref, wl1_ref, wr1_ref, b1_ref,
                     wl2_ref, wr2_ref, b2_ref, p_ref, wlin_ref, blin_ref,
                     o_ref, h1_scr, pooled_scr, *, tm, n_valid):
    layer = pl.program_id(0)
    i = pl.program_id(1)
    row = pl.multiple_of(i * tm, tm)

    a_tile = a_ref[...]                                            # (tm, Np) bf16
    hp = wl1_ref.shape[1]

    # Mask for padded node rows: keeps h1/h2 exactly zero there (robust even if
    # pooling / per-node normalization changes later).
    valid = (row + lax.broadcasted_iota(jnp.int32, (tm, hp), 0)) < n_valid

    # ---- layer 0: SAGEConv1 + ReLU, write this row tile of h1 into scratch ----
    @pl.when(layer == 0)
    def _():
        agg = jnp.dot(a_tile, x_ref[...], preferred_element_type=jnp.float32)
        xt = x_ref[pl.ds(row, tm), :]
        h = (jnp.dot(agg.astype(jnp.bfloat16), wl1_ref[...],
                     preferred_element_type=jnp.float32)
             + jnp.dot(xt, wr1_ref[...], preferred_element_type=jnp.float32)
             + b1_ref[...])
        # dropout(0.5): inference-mode identity (see TODO at top of file)
        h = jnp.where(valid, jnp.maximum(h, 0.0), 0.0)
        h1_scr[pl.ds(row, tm), :] = h.astype(jnp.bfloat16)

    # ---- layer 1: SAGEConv2 + ReLU + partial mean-pool accumulation -----------
    @pl.when((layer == 1) & (i == 0))
    def _():
        pooled_scr[...] = jnp.zeros_like(pooled_scr)

    @pl.when(layer == 1)
    def _():
        agg = jnp.dot(a_tile, h1_scr[...], preferred_element_type=jnp.float32)
        h1t = h1_scr[pl.ds(row, tm), :]
        h = (jnp.dot(agg.astype(jnp.bfloat16), wl2_ref[...],
                     preferred_element_type=jnp.float32)
             + jnp.dot(h1t, wr2_ref[...], preferred_element_type=jnp.float32)
             + b2_ref[...])
        h2 = jnp.where(valid, jnp.maximum(h, 0.0), 0.0).astype(jnp.bfloat16)
        pooled_scr[...] += jnp.dot(p_ref[...], h2,
                                   preferred_element_type=jnp.float32)

    # ---- finalize: Linear head on pooled graph embeddings ---------------------
    @pl.when((layer == 1) & (i == pl.num_programs(1) - 1))
    def _():
        out = (jnp.dot(pooled_scr[...].astype(jnp.bfloat16), wlin_ref[...],
                       preferred_element_type=jnp.float32) + blin_ref[...])
        o_ref[...] = out.astype(o_ref.dtype)


def fused_gnn(A_p, X_p, wl1, wr1, b1, wl2, wr2, b2, P_p, wlin, blin, *, n_valid):
    Np = A_p.shape[0]
    Cp = X_p.shape[1]
    Hp = wl1.shape[1]
    Bp = P_p.shape[0]
    Op = wlin.shape[1]

    # Row-tile size: largest of {512, 256, 128} dividing Np (bigger tiles amortize
    # the ~0.35us per-grid-step overhead; Np is always a multiple of 128).
    tm = next(t for t in (512, 256, 128) if Np % t == 0)
    n_tiles = Np // tm

    # ---- generation-aware VMEM budgeting (v7x: 64 MiB/TC, v5e/v6e: 128 MiB) ----
    try:
        vmem_cap = int(pltpu.get_tpu_info().vmem_capacity_bytes)
    except Exception:
        vmem_cap = 64 * 1024 * 1024
    bf, f32 = 2, 4
    need = (2 * tm * Np * bf                                # A tiles (double-buffered)
            + 2 * Np * Cp * bf                              # resident X (conservative x2)
            + 2 * bf * (2 * Cp * Hp + 2 * Hp * Hp + Hp * Op)  # weights
            + 2 * f32 * (3 * Hp + Op)                       # biases
            + 2 * Bp * tm * bf                              # P tiles
            + Np * Hp * bf                                  # h1 scratch
            + Bp * Hp * f32                                 # pooled scratch
            + 2 * Bp * Op * f32                             # output
            + 8 * tm * max(Cp, Hp) * f32)                   # matmul/relu temporaries
    assert need <= int(0.85 * vmem_cap), (
        f"padded graph too large for VMEM tiling (need {need} B, cap {vmem_cap} B)")
    vmem_limit = min(max(need + (8 << 20), 16 << 20), int(0.9 * vmem_cap))

    flops = 2 * (Np * Np * (Cp + Hp)                       # aggregations A@x, A@h1
                 + 2 * Np * Cp * Hp + 2 * Np * Hp * Hp     # lin_l + lin_r per layer
                 + Bp * Np * Hp + Bp * Hp * Op)            # pool + head
    bytes_accessed = (2 * Np * Np * bf                     # A streamed once per layer
                      + Np * Cp * bf + Bp * Np * bf
                      + bf * (2 * Cp * Hp + 2 * Hp * Hp + Hp * Op)
                      + f32 * (3 * Hp + Op) + Bp * Op * f32)

    kern = functools.partial(fused_gnn_kernel, tm=tm, n_valid=n_valid)

    grid_spec = pltpu.PrefetchScalarGridSpec(
        num_scalar_prefetch=0,
        grid=(2, n_tiles),
        in_specs=[
            pl.BlockSpec((tm, Np), lambda l, i: (i, 0)),   # A: streamed row tiles
            pl.BlockSpec((Np, Cp), lambda l, i: (0, 0)),   # X: resident
            pl.BlockSpec((Cp, Hp), lambda l, i: (0, 0)),   # W_l1
            pl.BlockSpec((Cp, Hp), lambda l, i: (0, 0)),   # W_r1
            pl.BlockSpec((1, Hp), lambda l, i: (0, 0)),    # b1
            pl.BlockSpec((Hp, Hp), lambda l, i: (0, 0)),   # W_l2
            pl.BlockSpec((Hp, Hp), lambda l, i: (0, 0)),   # W_r2
            pl.BlockSpec((1, Hp), lambda l, i: (0, 0)),    # b2
            pl.BlockSpec((Bp, tm), lambda l, i: (0, i)),   # P: streamed col tiles
            pl.BlockSpec((Hp, Op), lambda l, i: (0, 0)),   # W_lin
            pl.BlockSpec((1, Op), lambda l, i: (0, 0)),    # b_lin
        ],
        out_specs=pl.BlockSpec((Bp, Op), lambda l, i: (0, 0)),
        scratch_shapes=[pltpu.VMEM((Np, Hp), jnp.bfloat16),   # h1 (persists over grid)
                        pltpu.VMEM((Bp, Hp), jnp.float32)],   # pooled accumulator
    )

    return pl.pallas_call(
        kern,
        out_shape=jax.ShapeDtypeStruct((Bp, Op), jnp.float32),
        grid_spec=grid_spec,
        cost_estimate=pl.CostEstimate(flops=int(flops), transcendentals=0,
                                      bytes_accessed=int(bytes_accessed)),
        compiler_params=pltpu.CompilerParams(
            dimension_semantics=("arbitrary", "arbitrary"),
            vmem_limit_bytes=int(vmem_limit)),
    )(A_p, X_p, wl1, wr1, b1, wl2, wr2, b2, P_p, wlin, blin)


# ---------------------------------------------------------------------------
# Glue (plain JAX): padded bf16 aggregation / pooling matrices, param packing
# ---------------------------------------------------------------------------

def build_agg_matrix_padded(edge_index, num_nodes, n_pad):
    """A[dst, src] = 1/in_degree(dst); built directly padded, cast once to bf16."""
    src, dst = edge_index[0], edge_index[1]
    deg = jnp.zeros((num_nodes,), jnp.float32).at[dst].add(1.0)
    inv = 1.0 / jnp.maximum(deg, 1.0)
    A = jnp.zeros((n_pad, n_pad), jnp.float32).at[dst, src].add(inv[dst])
    return A.astype(jnp.bfloat16)


def build_pool_matrix_padded(batch, num_graphs, b_pad, n_pad):
    """P[g, i] = 1/|G_g| if batch[i] == g; built directly padded, cast to bf16."""
    n = batch.shape[0]
    counts = jnp.zeros((num_graphs,), jnp.float32).at[batch].add(1.0)
    inv = 1.0 / jnp.maximum(counts, 1.0)
    P = jnp.zeros((b_pad, n_pad), jnp.float32).at[batch, jnp.arange(n)].set(inv[batch])
    return P.astype(jnp.bfloat16)


def init_params(key, in_channels, hidden_channels, out_channels):
    ks = jax.random.split(key, 7)
    s = 0.1
    return {
        # SAGEConv1: lin_l (neighbors, with bias), lin_r (root, no bias)
        "wl1": s * jax.random.normal(ks[0], (in_channels, hidden_channels), jnp.float32),
        "wr1": s * jax.random.normal(ks[1], (in_channels, hidden_channels), jnp.float32),
        "bl1": s * jax.random.normal(ks[2], (1, hidden_channels), jnp.float32),
        # SAGEConv2
        "wl2": s * jax.random.normal(ks[3], (hidden_channels, hidden_channels), jnp.float32),
        "wr2": s * jax.random.normal(ks[4], (hidden_channels, hidden_channels), jnp.float32),
        "bl2": s * jax.random.normal(ks[5], (1, hidden_channels), jnp.float32),
        # final Linear
        "wlin": s * jax.random.normal(ks[6], (hidden_channels, out_channels), jnp.float32),
        "blin": jnp.zeros((1, out_channels), jnp.float32),
    }


def pack_params(params, in_channels, hidden_channels, out_channels):
    """Pad channel dims to 128 lanes; weights bf16 (MXU), biases f32."""
    Cp = _round_up(in_channels, 128)
    Hp = _round_up(hidden_channels, 128)
    Op = _round_up(out_channels, 128)
    wl1 = _pad_to(params["wl1"], (Cp, Hp)).astype(jnp.bfloat16)
    wr1 = _pad_to(params["wr1"], (Cp, Hp)).astype(jnp.bfloat16)
    b1 = _pad_to(params["bl1"], (1, Hp))
    wl2 = _pad_to(params["wl2"], (Hp, Hp)).astype(jnp.bfloat16)
    wr2 = _pad_to(params["wr2"], (Hp, Hp)).astype(jnp.bfloat16)
    b2 = _pad_to(params["bl2"], (1, Hp))
    wlin = _pad_to(params["wlin"], (Hp, Op)).astype(jnp.bfloat16)
    blin = _pad_to(params["blin"], (1, Op))
    return wl1, wr1, b1, wl2, wr2, b2, wlin, blin


def solidity_gnn_forward(params, x, edge_index, batch, num_graphs):
    N, C = x.shape
    H = params["wl1"].shape[1]
    O = params["wlin"].shape[1]

    Np = _round_up(N, 128)
    Cp = _round_up(C, 128)
    Bp = _round_up(num_graphs, 16)   # bf16 sublane tiling is 16

    A_p = build_agg_matrix_padded(edge_index, N, Np)
    P_p = build_pool_matrix_padded(batch, num_graphs, Bp, Np)
    X_p = _pad_to(x, (Np, Cp)).astype(jnp.bfloat16)

    wl1, wr1, b1, wl2, wr2, b2, wlin, blin = pack_params(params, C, H, O)

    out_p = fused_gnn(A_p, X_p, wl1, wr1, b1, wl2, wr2, b2, P_p, wlin, blin,
                      n_valid=N)
    return out_p[:num_graphs, :O]


# ---------------------------------------------------------------------------
# Pure-JAX f32 reference (for a loose correctness check in the demo)
# ---------------------------------------------------------------------------

def reference_forward(params, x, edge_index, batch, num_graphs):
    N = x.shape[0]
    src, dst = edge_index[0], edge_index[1]
    A = jnp.zeros((N, N), jnp.float32).at[dst, src].add(1.0)
    A = A / jnp.maximum(A.sum(-1, keepdims=True), 1.0)
    onehot = (batch[None, :] == jnp.arange(num_graphs)[:, None]).astype(jnp.float32)
    P = onehot / jnp.maximum(onehot.sum(-1, keepdims=True), 1.0)

    h = jnp.maximum(A @ x @ params["wl1"] + params["bl1"] + x @ params["wr1"], 0.0)
    h = jnp.maximum(A @ h @ params["wl2"] + params["bl2"] + h @ params["wr2"], 0.0)
    return P @ h @ params["wlin"] + params["blin"]


# ---------------------------------------------------------------------------
# Demo
# ---------------------------------------------------------------------------

if __name__ == "__main__":
    key = jax.random.PRNGKey(0)
    k_x, k_e, k_p = jax.random.split(key, 3)

    num_nodes = 16
    num_edges = 24
    in_channels, hidden_channels, out_channels = 8, 32, 4
    num_graphs = 2

    x = jax.random.normal(k_x, (num_nodes, in_channels), jnp.float32)
    edge_index = jax.random.randint(k_e, (2, num_edges), 0, num_nodes, jnp.int32)
    # first 8 nodes -> graph 0, last 8 -> graph 1
    batch = jnp.concatenate([jnp.zeros(8, jnp.int32), jnp.ones(8, jnp.int32)])

    params = init_params(k_p, in_channels, hidden_channels, out_channels)

    out = solidity_gnn_forward(params, x, edge_index, batch, num_graphs)
    jax.block_until_ready(out)
    assert out.shape == (num_graphs, out_channels)

    ref = reference_forward(params, x, edge_index, batch, num_graphs)
    # bf16 A / intermediates: allow ~1% class-level deviation vs f32 reference.
    assert jnp.allclose(out, ref, rtol=5e-2, atol=5e-2), (out, ref)

    print("KERNEL_OK")
</pallas_src>

<mosaic_0001>
module attributes {stable_mosaic.version = 11 : i64} {
  func.func @fused_gnn_kernel(%arg0: i32, %arg1: i32, %arg2: memref<128x128xbf16, #tpu.memory_space<vmem>>, %arg3: memref<128x128xbf16, #tpu.memory_space<vmem>>, %arg4: memref<128x128xbf16, #tpu.memory_space<vmem>>, %arg5: memref<128x128xbf16, #tpu.memory_space<vmem>>, %arg6: memref<1x128xf32, #tpu.memory_space<vmem>>, %arg7: memref<128x128xbf16, #tpu.memory_space<vmem>>, %arg8: memref<128x128xbf16, #tpu.memory_space<vmem>>, %arg9: memref<1x128xf32, #tpu.memory_space<vmem>>, %arg10: memref<16x128xbf16, #tpu.memory_space<vmem>>, %arg11: memref<128x128xbf16, #tpu.memory_space<vmem>>, %arg12: memref<1x128xf32, #tpu.memory_space<vmem>>, %arg13: memref<16x128xf32, #tpu.memory_space<vmem>>, %arg14: memref<128x128xbf16, #tpu.memory_space<vmem>>, %arg15: memref<16x128xf32, #tpu.memory_space<vmem>>) attributes {dimension_semantics = [#tpu.dimension_semantics<arbitrary>, #tpu.dimension_semantics<arbitrary>], iteration_bounds = array<i64: 2, 1>, scalar_prefetch = 0 : i64, scratch_operands = 2 : i64, tpu.core_type = #tpu.core_type<tc>, window_params = [{transform_indices = @transform_0, window_bounds = array<i64: 128, 128>}, {pipeline_mode = #tpu.pipeline_mode<synchronous>, transform_indices = @transform_1, window_bounds = array<i64: 128, 128>}, {pipeline_mode = #tpu.pipeline_mode<synchronous>, transform_indices = @transform_2, window_bounds = array<i64: 128, 128>}, {pipeline_mode = #tpu.pipeline_mode<synchronous>, transform_indices = @transform_3, window_bounds = array<i64: 128, 128>}, {pipeline_mode = #tpu.pipeline_mode<synchronous>, transform_indices = @transform_4, window_bounds = array<i64: 1, 128>}, {pipeline_mode = #tpu.pipeline_mode<synchronous>, transform_indices = @transform_5, window_bounds = array<i64: 128, 128>}, {pipeline_mode = #tpu.pipeline_mode<synchronous>, transform_indices = @transform_6, window_bounds = array<i64: 128, 128>}, {pipeline_mode = #tpu.pipeline_mode<synchronous>, transform_indices = @transform_7, window_bounds = array<i64: 1, 128>}, {transform_indices = @transform_8, window_bounds = array<i64: 16, 128>}, {pipeline_mode = #tpu.pipeline_mode<synchronous>, transform_indices = @transform_9, window_bounds = array<i64: 128, 128>}, {pipeline_mode = #tpu.pipeline_mode<synchronous>, transform_indices = @transform_10, window_bounds = array<i64: 1, 128>}, {pipeline_mode = #tpu.pipeline_mode<synchronous>, transform_indices = @transform_11, window_bounds = array<i64: 16, 128>}]} {
    %c128_i32 = arith.constant 128 : i32
    %0 = arith.muli %arg1, %c128_i32 : i32
    %1 = tpu.assume_multiple %0, 128 : i32
    %c0 = arith.constant 0 : index
    %c0_0 = arith.constant 0 : index
    %2 = vector.load %arg2[%c0, %c0_0] : memref<128x128xbf16, #tpu.memory_space<vmem>>, vector<128x128xbf16>
    %3 = tpu.iota {dimensions = array<i32: 0>} : vector<128x128xi32>
    %4 = vector.broadcast %1 : i32 to vector<128x128xi32>
    %5 = arith.addi %4, %3 : vector<128x128xi32>
    %c16_i32 = arith.constant 16 : i32
    %6 = vector.broadcast %c16_i32 : i32 to vector<128x128xi32>
    %7 = arith.cmpi slt, %5, %6 : vector<128x128xi32>
    %c0_i32 = arith.constant 0 : i32
    %8 = arith.cmpi eq, %arg0, %c0_i32 : i32
    %9 = arith.extui %8 : i1 to i32
    %c0_i32_1 = arith.constant 0 : i32
    %10 = arith.cmpi ne, %9, %c0_i32_1 : i32
    scf.if %10 {
      %c0_9 = arith.constant 0 : index
      %c0_10 = arith.constant 0 : index
      %24 = vector.load %arg3[%c0_9, %c0_10] : memref<128x128xbf16, #tpu.memory_space<vmem>>, vector<128x128xbf16>
      %cst = arith.constant dense<0.000000e+00> : vector<128x128xf32>
      %25 = tpu.matmul %2, %24, %cst {dimension_numbers = #tpu.dot_dimension_numbers<[1], [0], [0], [1], [0, 0, 1, 1], [], []>} : vector<128x128xbf16>, vector<128x128xbf16>, vector<128x128xf32> -> vector<128x128xf32>
      %26 = arith.index_cast %1 : i32 to index
      %c0_11 = arith.constant 0 : index
      %27 = vector.load %arg3[%26, %c0_11] : memref<128x128xbf16, #tpu.memory_space<vmem>>, vector<128x128xbf16>
      %28 = arith.truncf %25 : vector<128x128xf32> to vector<128x128xbf16>
      %c0_12 = arith.constant 0 : index
      %c0_13 = arith.constant 0 : index
      %29 = vector.load %arg4[%c0_12, %c0_13] : memref<128x128xbf16, #tpu.memory_space<vmem>>, vector<128x128xbf16>
      %cst_14 = arith.constant dense<0.000000e+00> : vector<128x128xf32>
      %30 = tpu.matmul %28, %29, %cst_14 {dimension_numbers = #tpu.dot_dimension_numbers<[1], [0], [0], [1], [0, 0, 1, 1], [], []>} : vector<128x128xbf16>, vector<128x128xbf16>, vector<128x128xf32> -> vector<128x128xf32>
      %c0_15 = arith.constant 0 : index
      %c0_16 = arith.constant 0 : index
      %31 = vector.load %arg5[%c0_15, %c0_16] : memref<128x128xbf16, #tpu.memory_space<vmem>>, vector<128x128xbf16>
      %cst_17 = arith.constant dense<0.000000e+00> : vector<128x128xf32>
      %32 = tpu.matmul %27, %31, %cst_17 {dimension_numbers = #tpu.dot_dimension_numbers<[1], [0], [0], [1], [0, 0, 1, 1], [], []>} : vector<128x128xbf16>, vector<128x128xbf16>, vector<128x128xf32> -> vector<128x128xf32>
      %33 = arith.addf %30, %32 : vector<128x128xf32>
      %c0_18 = arith.constant 0 : index
      %c0_19 = arith.constant 0 : index
      %34 = vector.load %arg6[%c0_18, %c0_19] : memref<1x128xf32, #tpu.memory_space<vmem>>, vector<1x128xf32>
      %35 = vector.broadcast %34 : vector<1x128xf32> to vector<128x128xf32>
      %36 = arith.addf %33, %35 : vector<128x128xf32>
      %cst_20 = arith.constant 0.000000e+00 : f32
      %37 = vector.broadcast %cst_20 : f32 to vector<128x128xf32>
      %38 = arith.maximumf %36, %37 : vector<128x128xf32>
      %cst_21 = arith.constant 0.000000e+00 : f32
      %39 = vector.broadcast %cst_21 : f32 to vector<128x128xf32>
      %40 = arith.select %7, %38, %39 : vector<128x128xi1>, vector<128x128xf32>
      %41 = arith.truncf %40 : vector<128x128xf32> to vector<128x128xbf16>
      %42 = arith.index_cast %1 : i32 to index
      %c0_22 = arith.constant 0 : index
      %43 = vector.load %arg14[%42, %c0_22] : memref<128x128xbf16, #tpu.memory_space<vmem>>, vector<128x128xbf16>
      tpu.vector_store %arg14[%42, %c0_22], %41 {strides = array<i32>} : memref<128x128xbf16, #tpu.memory_space<vmem>>, vector<128x128xbf16>,
    } else {
    }
    %c1_i32 = arith.constant 1 : i32
    %11 = arith.cmpi eq, %arg0, %c1_i32 : i32
    %c0_i32_2 = arith.constant 0 : i32
    %12 = arith.cmpi eq, %arg1, %c0_i32_2 : i32
    %13 = arith.andi %11, %12 : i1
    %14 = arith.extui %13 : i1 to i32
    %c0_i32_3 = arith.constant 0 : i32
    %15 = arith.cmpi ne, %14, %c0_i32_3 : i32
    scf.if %15 {
      %cst = arith.constant 0.000000e+00 : f32
      %24 = vector.broadcast %cst : f32 to vector<16x128xf32>
      %c0_9 = arith.constant 0 : index
      %c0_10 = arith.constant 0 : index
      %25 = vector.load %arg15[%c0_9, %c0_10] : memref<16x128xf32, #tpu.memory_space<vmem>>, vector<16x128xf32>
      tpu.vector_store %arg15[%c0_9, %c0_10], %24 {strides = array<i32>} : memref<16x128xf32, #tpu.memory_space<vmem>>, vector<16x128xf32>,
    } else {
    }
    %c1_i32_4 = arith.constant 1 : i32
    %16 = arith.cmpi eq, %arg0, %c1_i32_4 : i32
    %17 = arith.extui %16 : i1 to i32
    %c0_i32_5 = arith.constant 0 : i32
    %18 = arith.cmpi ne, %17, %c0_i32_5 : i32
    scf.if %18 {
      %c0_9 = arith.constant 0 : index
      %c0_10 = arith.constant 0 : index
      %24 = vector.load %arg14[%c0_9, %c0_10] : memref<128x128xbf16, #tpu.memory_space<vmem>>, vector<128x128xbf16>
      %cst = arith.constant dense<0.000000e+00> : vector<128x128xf32>
      %25 = tpu.matmul %2, %24, %cst {dimension_numbers = #tpu.dot_dimension_numbers<[1], [0], [0], [1], [0, 0, 1, 1], [], []>} : vector<128x128xbf16>, vector<128x128xbf16>, vector<128x128xf32> -> vector<128x128xf32>
      %26 = arith.index_cast %1 : i32 to index
      %c0_11 = arith.constant 0 : index
      %27 = vector.load %arg14[%26, %c0_11] : memref<128x128xbf16, #tpu.memory_space<vmem>>, vector<128x128xbf16>
      %28 = arith.truncf %25 : vector<128x128xf32> to vector<128x128xbf16>
      %c0_12 = arith.constant 0 : index
      %c0_13 = arith.constant 0 : index
      %29 = vector.load %arg7[%c0_12, %c0_13] : memref<128x128xbf16, #tpu.memory_space<vmem>>, vector<128x128xbf16>
      %cst_14 = arith.constant dense<0.000000e+00> : vector<128x128xf32>
      %30 = tpu.matmul %28, %29, %cst_14 {dimension_numbers = #tpu.dot_dimension_numbers<[1], [0], [0], [1], [0, 0, 1, 1], [], []>} : vector<128x128xbf16>, vector<128x128xbf16>, vector<128x128xf32> -> vector<128x128xf32>
      %c0_15 = arith.constant 0 : index
      %c0_16 = arith.constant 0 : index
      %31 = vector.load %arg8[%c0_15, %c0_16] : memref<128x128xbf16, #tpu.memory_space<vmem>>, vector<128x128xbf16>
      %cst_17 = arith.constant dense<0.000000e+00> : vector<128x128xf32>
      %32 = tpu.matmul %27, %31, %cst_17 {dimension_numbers = #tpu.dot_dimension_numbers<[1], [0], [0], [1], [0, 0, 1, 1], [], []>} : vector<128x128xbf16>, vector<128x128xbf16>, vector<128x128xf32> -> vector<128x128xf32>
      %33 = arith.addf %30, %32 : vector<128x128xf32>
      %c0_18 = arith.constant 0 : index
      %c0_19 = arith.constant 0 : index
      %34 = vector.load %arg9[%c0_18, %c0_19] : memref<1x128xf32, #tpu.memory_space<vmem>>, vector<1x128xf32>
      %35 = vector.broadcast %34 : vector<1x128xf32> to vector<128x128xf32>
      %36 = arith.addf %33, %35 : vector<128x128xf32>
      %cst_20 = arith.constant 0.000000e+00 : f32
      %37 = vector.broadcast %cst_20 : f32 to vector<128x128xf32>
      %38 = arith.maximumf %36, %37 : vector<128x128xf32>
      %cst_21 = arith.constant 0.000000e+00 : f32
      %39 = vector.broadcast %cst_21 : f32 to vector<128x128xf32>
      %40 = arith.select %7, %38, %39 : vector<128x128xi1>, vector<128x128xf32>
      %41 = arith.truncf %40 : vector<128x128xf32> to vector<128x128xbf16>
      %c0_22 = arith.constant 0 : index
      %c0_23 = arith.constant 0 : index
      %42 = vector.load %arg15[%c0_22, %c0_23] : memref<16x128xf32, #tpu.memory_space<vmem>>, vector<16x128xf32>
      %c0_24 = arith.constant 0 : index
      %c0_25 = arith.constant 0 : index
      %43 = vector.load %arg10[%c0_24, %c0_25] : memref<16x128xbf16, #tpu.memory_space<vmem>>, vector<16x128xbf16>
      %cst_26 = arith.constant dense<0.000000e+00> : vector<16x128xf32>
      %44 = tpu.matmul %43, %41, %cst_26 {dimension_numbers = #tpu.dot_dimension_numbers<[1], [0], [0], [1], [0, 0, 1, 1], [], []>} : vector<16x128xbf16>, vector<128x128xbf16>, vector<16x128xf32> -> vector<16x128xf32>
      %45 = arith.addf %42, %44 : vector<16x128xf32>
      %c0_27 = arith.constant 0 : index
      %c0_28 = arith.constant 0 : index
      %46 = vector.load %arg15[%c0_27, %c0_28] : memref<16x128xf32, #tpu.memory_space<vmem>>, vector<16x128xf32>
      tpu.vector_store %arg15[%c0_27, %c0_28], %45 {strides = array<i32>} : memref<16x128xf32, #tpu.memory_space<vmem>>, vector<16x128xf32>,
    } else {
    }
    %c1_i32_6 = arith.constant 1 : i32
    %19 = arith.cmpi eq, %arg0, %c1_i32_6 : i32
    %c0_i32_7 = arith.constant 0 : i32
    %20 = arith.cmpi eq, %arg1, %c0_i32_7 : i32
    %21 = arith.andi %19, %20 : i1
    %22 = arith.extui %21 : i1 to i32
    %c0_i32_8 = arith.constant 0 : i32
    %23 = arith.cmpi ne, %22, %c0_i32_8 : i32
    scf.if %23 {
      %c0_9 = arith.constant 0 : index
      %c0_10 = arith.constant 0 : index
      %24 = vector.load %arg15[%c0_9, %c0_10] : memref<16x128xf32, #tpu.memory_space<vmem>>, vector<16x128xf32>
      %25 = arith.truncf %24 : vector<16x128xf32> to vector<16x128xbf16>
      %c0_11 = arith.constant 0 : index
      %c0_12 = arith.constant 0 : index
      %26 = vector.load %arg11[%c0_11, %c0_12] : memref<128x128xbf16, #tpu.memory_space<vmem>>, vector<128x128xbf16>
      %cst = arith.constant dense<0.000000e+00> : vector<16x128xf32>
      %27 = tpu.matmul %25, %26, %cst {dimension_numbers = #tpu.dot_dimension_numbers<[1], [0], [0], [1], [0, 0, 1, 1], [], []>} : vector<16x128xbf16>, vector<128x128xbf16>, vector<16x128xf32> -> vector<16x128xf32>
      %c0_13 = arith.constant 0 : index
      %c0_14 = arith.constant 0 : index
      %28 = vector.load %arg12[%c0_13, %c0_14] : memref<1x128xf32, #tpu.memory_space<vmem>>, vector<1x128xf32>
      %29 = vector.broadcast %28 : vector<1x128xf32> to vector<16x128xf32>
      %30 = arith.addf %27, %29 : vector<16x128xf32>
      %c0_15 = arith.constant 0 : index
      %c0_16 = arith.constant 0 : index
      %31 = vector.load %arg13[%c0_15, %c0_16] : memref<16x128xf32, #tpu.memory_space<vmem>>, vector<16x128xf32>
      tpu.vector_store %arg13[%c0_15, %c0_16], %30 {strides = array<i32>} : memref<16x128xf32, #tpu.memory_space<vmem>>, vector<16x128xf32>,
    } else {
    }
    return
  }
  func.func @transform_0(%arg0: i32, %arg1: i32) -> (i32, i32) {
    %c0_i32 = arith.constant 0 : i32
    %c0_i32_0 = arith.constant 0 : i32
    return %arg1, %c0_i32 : i32, i32
  }
  func.func @transform_1(%arg0: i32, %arg1: i32) -> (i32, i32) {
    %c0_i32 = arith.constant 0 : i32
    %c0_i32_0 = arith.constant 0 : i32
    %c0_i32_1 = arith.constant 0 : i32
    return %c0_i32, %c0_i32_0 : i32, i32
  }
  func.func @transform_2(%arg0: i32, %arg1: i32) -> (i32, i32) {
    %c0_i32 = arith.constant 0 : i32
    %c0_i32_0 = arith.constant 0 : i32
    %c0_i32_1 = arith.constant 0 : i32
    return %c0_i32, %c0_i32_0 : i32, i32
  }
  func.func @transform_3(%arg0: i32, %arg1: i32) -> (i32, i32) {
    %c0_i32 = arith.constant 0 : i32
    %c0_i32_0 = arith.constant 0 : i32
    %c0_i32_1 = arith.constant 0 : i32
    return %c0_i32, %c0_i32_0 : i32, i32
  }
  func.func @transform_4(%arg0: i32, %arg1: i32) -> (i32, i32) {
    %c0_i32 = arith.constant 0 : i32
    %c0_i32_0 = arith.constant 0 : i32
    %c0_i32_1 = arith.constant 0 : i32
    return %c0_i32, %c0_i32_0 : i32, i32
  }
  func.func @transform_5(%arg0: i32, %arg1: i32) -> (i32, i32) {
    %c0_i32 = arith.constant 0 : i32
    %c0_i32_0 = arith.constant 0 : i32
    %c0_i32_1 = arith.constant 0 : i32
    return %c0_i32, %c0_i32_0 : i32, i32
  }
  func.func @transform_6(%arg0: i32, %arg1: i32) -> (i32, i32) {
    %c0_i32 = arith.constant 0 : i32
    %c0_i32_0 = arith.constant 0 : i32
    %c0_i32_1 = arith.constant 0 : i32
    return %c0_i32, %c0_i32_0 : i32, i32
  }
  func.func @transform_7(%arg0: i32, %arg1: i32) -> (i32, i32) {
    %c0_i32 = arith.constant 0 : i32
    %c0_i32_0 = arith.constant 0 : i32
    %c0_i32_1 = arith.constant 0 : i32
    return %c0_i32, %c0_i32_0 : i32, i32
  }
  func.func @transform_8(%arg0: i32, %arg1: i32) -> (i32, i32) {
    %c0_i32 = arith.constant 0 : i32
    %c0_i32_0 = arith.constant 0 : i32
    return %c0_i32, %arg1 : i32, i32
  }
  func.func @transform_9(%arg0: i32, %arg1: i32) -> (i32, i32) {
    %c0_i32 = arith.constant 0 : i32
    %c0_i32_0 = arith.constant 0 : i32
    %c0_i32_1 = arith.constant 0 : i32
    return %c0_i32, %c0_i32_0 : i32, i32
  }
  func.func @transform_10(%arg0: i32, %arg1: i32) -> (i32, i32) {
    %c0_i32 = arith.constant 0 : i32
    %c0_i32_0 = arith.constant 0 : i32
    %c0_i32_1 = arith.constant 0 : i32
    return %c0_i32, %c0_i32_0 : i32, i32
  }
  func.func @transform_11(%arg0: i32, %arg1: i32) -> (i32, i32) {
    %c0_i32 = arith.constant 0 : i32
    %c0_i32_0 = arith.constant 0 : i32
    %c0_i32_1 = arith.constant 0 : i32
    return %c0_i32, %c0_i32_0 : i32, i32
  }
}

</mosaic_0001>

<bundles_post_ra>
// kernel: tpu_custom_call.1
= control target key start
LH: loop header
LB: loop body
LE: loop exit
PB: predicated region body
PF: predicated region fallthrough
CT: control target
= control target key end

     0   :  { %s3485_s0 = inlined_call_operand.hbm [shape: bf16[128,128], index: 0, kind: input, shape index: {}]   ;;  %s3486_s1 = inlined_call_operand.hbm [shape: bf16[128,128], index: 1, kind: input, shape index: {}]   ;;  %s3487_s2 = inlined_call_operand.hbm [shape: bf16[128,128], index: 2, kind: input, shape index: {}]   ;;  %s3488_s3 = inlined_call_operand.hbm [shape: bf16[128,128], index: 3, kind: input, shape index: {}]   ;;  %s3489_s4 = inlined_call_operand.vmem [shape: f32[1,128], index: 4, kind: input, shape index: {}]   ;;  %s3490_s5 = inlined_call_operand.hbm [shape: bf16[128,128], index: 5, kind: input, shape index: {}]   ;;  %s3491_s6 = inlined_call_operand.hbm [shape: bf16[128,128], index: 6, kind: input, shape index: {}]   ;;  %s3492_s7 = inlined_call_operand.vmem [shape: f32[1,128], index: 7, kind: input, shape index: {}]   ;;  %s3493_s8 = inlined_call_operand.vmem [shape: bf16[16,128], index: 8, kind: input, shape index: {}]   ;;  %s3494_s9 = inlined_call_operand.hbm [shape: bf16[128,128], index: 9, kind: input, shape index: {}]   ;;  %s3495_s10 = inlined_call_operand.vmem [shape: f32[1,128], index: 10, kind: input, shape index: {}]   ;;  %s3496_s11 = inlined_call_operand.hbm [shape: f32[16,128], index: 11, kind: output, shape index: {}]  }
   0x1   :  { %3503 = sst [smem:[#allocation23_spill]] %s3486_s1 }
   0x2   :  { %3504 = sst [smem:[#allocation24_spill]] %s3488_s3 }
   0x3   :  { %3505 = sst [smem:[#allocation25_spill]] %s3496_s11 }
   0x4   :  { %16 = vsyncpa [#allocation5], 0 }
   0x5   :  { %17 = vsyncpa [#allocation8], 0 }
   0x6   :  { %18 = vsyncpa [#allocation11], 0 }
   0x7   :  { %19 = vsyncpa [#allocation14], 0 }
   0x8   :  { %20 = vsyncpa [#allocation6], 0  ;;  %s3099_s17 = smov 0   ;;  %s3101_s18 = smov 0  }
   0x9   :  { %s3103_s19 = smov 0  }
   0xa LB: > { %3506 = sst [smem:[#allocation22_spill]] %s3019_s19  ;;  %s3497_s20 = sadd.s32 4294967295, %s3019_s19   ;;  %s3019_s19 = sphi %s3103_s19, %s3522_s19   ;;  %s3015_s18 = sphi %s3101_s18, %s3521_s18   ;;  %s3011_s17 = sphi %s3099_s17, %s3520_s17  }
   0xb   : > { %p2128_p0 = scmp.ge.s32.totalorder %s3019_s19, 1  ;;  %p305_p1 = scmp.lt.s32.totalorder %s3019_s19, 3 }
   0xc   : > { %p3119_p2 = scmp.eq.s32.totalorder %s3497_s20, 0  ;;  %s3021_s23 = smov [#allocation7]  }
   0xd   : > { %p3123_p3 = pnand %p2128_p0, %p305_p1  ;;  %s333_s24 = sshll.u32 %s3021_s23, 4  ;;  %s3127_s24 = int_to_ptr.vmem [resolvable:$true] %s333_s24 }
   0xe   : > { %s3507_s21 = scalar_select %p3119_p2, 1, 0 }
   0xf   : > { %s3508_s22 = scalar_select %p3123_p3, 1, 0 }
  0x10   : > { %p2618_p4 = pneg %p3123_p3  ;;  %s3022_s25 = smov [#allocation10]  }
  0x11   : > { %s359_s26 = sshll.u32 %s3022_s25, 4  ;;  %s3023_s28 = smov [#allocation13]   ;;  %s3131_s26 = int_to_ptr.vmem [resolvable:$true] %s359_s26 }
  0x12   : > { %p3135_p5 = pnand %p3119_p2, %p2618_p4  ;;  %s388_s29 = sshll.u32 %s3023_s28, 4  ;;  %s3139_s29 = int_to_ptr.vmem [resolvable:$true] %s388_s29 }
  0x13   : > { %s3510_s1 = sld [smem:[#allocation23_spill]] }
  0x14   : > { %p3149_p7 = pneg %p3135_p5 }
  0x19   : > { %s2755_s13 = scalar_lea.hbm %s3510_s1, 1024 }
  0x1a   : > { %p2756_p6 = scmp.ne.s32.totalorder %s3510_s1, %s2755_s13  ;;  %p2762_p10 = scmp.lt.u32.totalorder %s2755_s13, %s3510_s1 }
  0x1c   : > { %p2758_p8 = pnand %p3149_p7, %p2756_p6 }
  0x1e   : > { %p2759_p9 = pneg %p2758_p8 }
  0x20   : > { %p2764_p11 = pnand %p2762_p10, %p2759_p9 }
  0x22   : > { %2767 = shalt.err (!%p2764_p11)
}
  0x23   : > { %s2768_s28 = scalar_lea.vmem %s3127_s24, 1024  ;;  %p2776_p1 = scmp.lt.s32.totalorder %s3127_s24, %s3127_s24 }
  0x24   : > { %p2769_p12 = scmp.ne.s32.totalorder %s3127_s24, %s2768_s28  ;;  %p2777_p4 = scmp.lt.s32.totalorder %s2768_s28, %s2768_s28 }
  0x26   : > { %p2771_p13 = pnand %p2769_p12, %p3149_p7  ;;  %p2778_p6 = por %p2777_p4, %p2776_p1 }
  0x28   : > { %p2772_p0 = pneg %p2771_p13 }
  0x2a   : > { %p2779_p8 = pnand %p2778_p6, %p2772_p0 }
  0x2c   : > { %2782 = shalt.err (!%p2779_p8)
}
  0x2d   : > { %s3024_s30 = smov 64   ;;  %s3025_s12 = smov 4  }
  0x2e   : > { %2624 = dma.hbm_to_vmem [thread:$0]  (!%p3135_p5), %s3510_s1, 1024, %s3127_s24, [#allocation8], %s3024_s30, %s3024_s30, %s3025_s12  }
  0x2f   : > { %s3512_s3 = sld [smem:[#allocation24_spill]] }
  0x35   : > { %s2783_s25 = scalar_lea.hbm %s3512_s3, 1024 }
  0x36   : > { %p2784_p9 = scmp.ne.s32.totalorder %s3512_s3, %s2783_s25  ;;  %p2790_p12 = scmp.lt.u32.totalorder %s2783_s25, %s3512_s3 }
  0x38   : > { %p2786_p10 = pnand %p2784_p9, %p3149_p7 }
  0x3a   : > { %p2787_p11 = pneg %p2786_p10 }
  0x3c   : > { %p2792_p13 = pnand %p2790_p12, %p2787_p11 }
  0x3e   : > { %2795 = shalt.err (!%p2792_p13)
}
  0x3f   : > { %s2796_s24 = scalar_lea.vmem %s3131_s26, 1024  ;;  %p2804_p6 = scmp.lt.s32.totalorder %s3131_s26, %s3131_s26 }
  0x40   : > { %p2797_p0 = scmp.ne.s32.totalorder %s3131_s26, %s2796_s24  ;;  %p2805_p8 = scmp.lt.s32.totalorder %s2796_s24, %s2796_s24 }
  0x42   : > { %p2799_p1 = pnand %p2797_p0, %p3149_p7  ;;  %p2806_p9 = por %p2805_p8, %p2804_p6 }
  0x44   : > { %p2800_p4 = pneg %p2799_p1 }
  0x46   : > { %p2807_p10 = pnand %p2806_p9, %p2800_p4 }
  0x48   : > { %2810 = shalt.err (!%p2807_p10)
}
  0x49   : > { %2630 = dma.hbm_to_vmem [thread:$0]  (!%p3135_p5), %s3512_s3, 1024, %s3131_s26, [#allocation11], %s3024_s30, %s3024_s30, %s3025_s12  }
  0x4a   : > { %s2811_s14 = scalar_lea.hbm %s3491_s6, 1024 }
  0x4b   : > { %p2812_p11 = scmp.ne.s32.totalorder %s3491_s6, %s2811_s14  ;;  %p2818_p0 = scmp.lt.u32.totalorder %s2811_s14, %s3491_s6 }
  0x4d   : > { %p2814_p12 = pnand %p2812_p11, %p3149_p7 }
  0x4f   : > { %p2815_p13 = pneg %p2814_p12 }
  0x51   : > { %p2820_p1 = pnand %p2818_p0, %p2815_p13 }
  0x53   : > { %2823 = shalt.err (!%p2820_p1)
}
  0x54   : > { %s2824_s26 = scalar_lea.vmem %s3139_s29, 1024  ;;  %p2832_p9 = scmp.lt.s32.totalorder %s3139_s29, %s3139_s29 }
  0x55   : > { %p2825_p4 = scmp.ne.s32.totalorder %s3139_s29, %s2824_s26  ;;  %p2833_p10 = scmp.lt.s32.totalorder %s2824_s26, %s2824_s26 }
  0x57   : > { %p2827_p6 = pnand %p2825_p4, %p3149_p7  ;;  %p2834_p11 = por %p2833_p10, %p2832_p9 }
  0x59   : > { %p2828_p8 = pneg %p2827_p6 }
  0x5b   : > { %p2835_p12 = pnand %p2834_p11, %p2828_p8 }
  0x5d   : > { %2838 = shalt.err (!%p2835_p12)
}
  0x5e   : > { %2636 = dma.hbm_to_vmem [thread:$0]  (!%p3135_p5), %s3491_s6, 1024, %s3139_s29, [#allocation14], %s3024_s30, %s3024_s30, %s3025_s12  }
  0x5f   : > { %s38_s19 = sadd.s32 1, %s3015_s18  ;;  %s3026_s20 = smov [#allocation4]  }
  0x60   : > { %p40_p13 = scmp.ge.s32.totalorder %s38_s19, 2  ;;  %s320_s13 = sshll.u32 %s3026_s20, 4  ;;  %s321_s13 = int_to_ptr.vmem [resolvable:$true] %s320_s13 }
  0x61   : > { %s2839_s23 = scalar_lea.hbm %s3485_s0, 1024 }
  0x62   : > { %s3524_s19 = smov (%p40_p13, %s38_s19), 0  ;;  %p2840_p0 = scmp.ne.s32.totalorder %s3485_s0, %s2839_s23 }
  0x63   : > { %p2846_p6 = scmp.lt.u32.totalorder %s2839_s23, %s3485_s0 }
  0x64   : > { %p2842_p1 = pnand %p2840_p0, %p3149_p7 }
  0x66   : > { %p2843_p4 = pneg %p2842_p1 }
  0x68   : > { %p2848_p8 = pnand %p2846_p6, %p2843_p4 }
  0x6a   : > { %2851 = shalt.err (!%p2848_p8)
}
  0x6b   : > { %s2852_s24 = scalar_lea.vmem %s321_s13, 1024  ;;  %p2860_p12 = scmp.lt.s32.totalorder %s321_s13, %s321_s13 }
  0x6c   : > { %p2853_p9 = scmp.ne.s32.totalorder %s321_s13, %s2852_s24  ;;  %p2861_p13 = scmp.lt.s32.totalorder %s2852_s24, %s2852_s24 }
  0x6e   : > { %p2855_p10 = pnand %p2853_p9, %p3149_p7  ;;  %p2862_p2 = por %p2861_p13, %p2860_p12 }
  0x70   : > { %p2856_p11 = pneg %p2855_p10 }
  0x72   : > { %p2863_p3 = pnand %p2862_p2, %p2856_p11 }
  0x74   : > { %2866 = shalt.err (!%p2863_p3)
}
  0x75   : > { %2621 = dma.hbm_to_vmem [thread:$0]  (!%p3135_p5), %s3485_s0, 1024, %s321_s13, [#allocation5], %s3024_s30, %s3024_s30, %s3025_s12  }
  0x76   : > { %s3027_s14 = smov [#allocation9]   ;;  %s3028_s23 = smov [#allocation12]  }
  0x77   : > { %s346_s15 = sshll.u32 %s3027_s14, 4  ;;  %s375_s25 = sshll.u32 %s3028_s23, 4  ;;  %s347_s15 = int_to_ptr.vmem [resolvable:$true] %s346_s15  ;;  %s376_s25 = int_to_ptr.vmem [resolvable:$true] %s375_s25 }
  0x78   : > { %s2867_s29 = scalar_lea.hbm %s3487_s2, 1024 }
  0x79   : > { %p2868_p2 = scmp.ne.s32.totalorder %s3487_s2, %s2867_s29  ;;  %p2874_p1 = scmp.lt.u32.totalorder %s2867_s29, %s3487_s2 }
  0x7b   : > { %p2870_p3 = pnand %p2868_p2, %p3149_p7 }
  0x7d   : > { %p2871_p0 = pneg %p2870_p3 }
  0x7f   : > { %p2876_p4 = pnand %p2874_p1, %p2871_p0 }
  0x81   : > { %2879 = shalt.err (!%p2876_p4)
}
  0x82   : > { %s2880_s13 = scalar_lea.vmem %s347_s15, 1024  ;;  %p2888_p10 = scmp.lt.s32.totalorder %s347_s15, %s347_s15 }
  0x83   : > { %p2881_p6 = scmp.ne.s32.totalorder %s347_s15, %s2880_s13  ;;  %p2889_p11 = scmp.lt.s32.totalorder %s2880_s13, %s2880_s13 }
  0x85   : > { %p2883_p8 = pnand %p2881_p6, %p3149_p7  ;;  %p2890_p12 = por %p2889_p11, %p2888_p10 }
  0x87   : > { %p2884_p9 = pneg %p2883_p8 }
  0x89   : > { %p2891_p13 = pnand %p2890_p12, %p2884_p9 }
  0x8b   : > { %2894 = shalt.err (!%p2891_p13)
}
  0x8c   : > { %2627 = dma.hbm_to_vmem [thread:$0]  (!%p3135_p5), %s3487_s2, 1024, %s347_s15, [#allocation8], %s3024_s30, %s3024_s30, %s3025_s12  }
  0x8d   : > { %s2895_s23 = scalar_lea.hbm %s3490_s5, 1024 }
  0x8e   : > { %p2896_p2 = scmp.ne.s32.totalorder %s3490_s5, %s2895_s23  ;;  %p2902_p1 = scmp.lt.u32.totalorder %s2895_s23, %s3490_s5 }
  0x90   : > { %p2898_p3 = pnand %p2896_p2, %p3149_p7 }
  0x92   : > { %p2899_p0 = pneg %p2898_p3 }
  0x94   : > { %p2904_p4 = pnand %p2902_p1, %p2899_p0 }
  0x96   : > { %2907 = shalt.err (!%p2904_p4)
}
  0x97   : > { %s2908_s11 = scalar_lea.vmem %s376_s25, 1024  ;;  %p2916_p10 = scmp.lt.s32.totalorder %s376_s25, %s376_s25 }
  0x98   : > { %p2909_p6 = scmp.ne.s32.totalorder %s376_s25, %s2908_s11  ;;  %p2917_p11 = scmp.lt.s32.totalorder %s2908_s11, %s2908_s11 }
  0x9a   : > { %p2911_p8 = pnand %p2909_p6, %p3149_p7  ;;  %p2918_p12 = por %p2917_p11, %p2916_p10 }
  0x9c   : > { %p2912_p9 = pneg %p2911_p8 }
  0x9e   : > { %p2919_p13 = pnand %p2918_p12, %p2912_p9 }
  0xa0   : > { %2922 = shalt.err (!%p2919_p13)
}
  0xa1   : > { %2633 = dma.hbm_to_vmem [thread:$0]  (!%p3135_p5), %s3490_s5, 1024, %s376_s25, [#allocation11], %s3024_s30, %s3024_s30, %s3025_s12  }
  0xa2   : > { %s3029_s1 = smov [#allocation15]   ;;  %s2923_s23 = scalar_lea.hbm %s3494_s9, 1024 }
  0xa3   : > { %s411_s3 = sshll.u32 %s3029_s1, 4  ;;  %p2924_p2 = scmp.ne.s32.totalorder %s3494_s9, %s2923_s23  ;;  %s412_s3 = int_to_ptr.vmem [resolvable:$true] %s411_s3 }
  0xa4   : > { %p2930_p1 = scmp.lt.u32.totalorder %s2923_s23, %s3494_s9 }
  0xa5   : > { %p2926_p3 = pnand %p2924_p2, %p3149_p7 }
  0xa7   : > { %p2927_p0 = pneg %p2926_p3 }
  0xa9   : > { %p2932_p4 = pnand %p2930_p1, %p2927_p0 }
  0xab   : > { %2935 = shalt.err (!%p2932_p4)
}
  0xac   : > { %s2936_s25 = scalar_lea.vmem %s412_s3, 1024  ;;  %p2944_p10 = scmp.lt.s32.totalorder %s412_s3, %s412_s3 }
  0xad   : > { %p2937_p6 = scmp.ne.s32.totalorder %s412_s3, %s2936_s25  ;;  %p2945_p11 = scmp.lt.s32.totalorder %s2936_s25, %s2936_s25 }
  0xaf   : > { %p2939_p8 = pnand %p2937_p6, %p3149_p7  ;;  %p2946_p12 = por %p2945_p11, %p2944_p10 }
  0xb1   : > { %p2940_p9 = pneg %p2939_p8 }
  0xb3   : > { %p2947_p13 = pnand %p2946_p12, %p2940_p9 }
  0xb5   : > { %2950 = shalt.err (!%p2947_p13)
}
  0xb6   : > { %2639 = dma.hbm_to_vmem [thread:$0]  (!%p3135_p5), %s3494_s9, 1024, %s412_s3, [#allocation14], %s3024_s30, %s3024_s30, %s3025_s12  }
  0xb7   : > { %p3513_p2 = scmp.ne.s32.totalorder %s3508_s22, 0 }
  0xb8   : > { %p3514_p7 = scmp.ne.s32.totalorder (!%p3513_p2), %s3507_s21, 0 }
  0xb9   : > { %430 = sbr.rel (%p3513_p2) target bundleno = 1685 (0x695), region = 64 }
  0xc0   : > { %2990 = dma.done.wait (%p3514_p7), [#allocation5], 1024  }
  0xc1   : > { %2992 = vsyncadd (%p3514_p7), [#allocation5], 4294966272 }
  0xc2   : > { %2994 = dma.done.wait (%p3514_p7), [#allocation8], 2048  }
  0xc3   : > { %2996 = vsyncadd (%p3514_p7), [#allocation8], 4294965248 }
  0xc4   : > { %2998 = dma.done.wait (%p3514_p7), [#allocation11], 2048  }
  0xc5   : > { %3000 = vsyncadd (%p3514_p7), [#allocation11], 4294965248 }
  0xc6   : > { %3002 = dma.done.wait (%p3514_p7), [#allocation14], 2048  }
  0xc7   : > { %3004 = vsyncadd (%p3514_p7), [#allocation14], 4294965248  ;;  %v3330_v0 = vld [vmem:[#allocation4] sm:$0xf]  ;;  %v3332_v1 = vld [vmem:[#allocation4 + $0x4] sm:$0xf] }
  0xc8   : > { %v3334_v2 = vld [vmem:[#allocation4 + $0x8] sm:$0xf]  ;;  %v3336_v3 = vld [vmem:[#allocation4 + $0xc] sm:$0xf]  ;;  %v3338_v4 = vld [vmem:[#allocation4 + $0x10] sm:$0xf] }
  0xc9   : > { %v3340_v5 = vld [vmem:[#allocation4 + $0x14] sm:$0xf]  ;;  %v3342_v6 = vld [vmem:[#allocation4 + $0x18] sm:$0xf]  ;;  %v3344_v7 = vld [vmem:[#allocation4 + $0x1c] sm:$0xf] }
  0xca   : > { %v3346_v8 = vld [vmem:[#allocation4 + $0x20] sm:$0xf]  ;;  %v3348_v9 = vld [vmem:[#allocation4 + $0x24] sm:$0xf]  ;;  %v3350_v10 = vld [vmem:[#allocation4 + $0x28] sm:$0xf] }
  0xcb   : > { %v3352_v11 = vld [vmem:[#allocation4 + $0x2c] sm:$0xf]  ;;  %v3354_v12 = vld [vmem:[#allocation4 + $0x30] sm:$0xf]  ;;  %v3356_v13 = vld [vmem:[#allocation4 + $0x34] sm:$0xf] }
  0xcc   : > { %v3358_v14 = vld [vmem:[#allocation4 + $0x38] sm:$0xf]  ;;  %v3360_v15 = vld [vmem:[#allocation4 + $0x3c] sm:$0xf]  ;;  %p2145_p5 = scmp.ne.s32.totalorder %s3011_s17, 0 }
  0xcd   : > { %v2698_v16 = vld [vmem:[#allocation7] sm:$0xff] (!%p2145_p5)   ;;  %v2146_v17 = vcombine.low (!%p2145_p5), %v3330_v0, %v3332_v1  ;;  %v2699_v18 = vld [vmem:[#allocation7 + $0x8] sm:$0xff] (!%p2145_p5)   ;;  %v2700_v19 = vld [vmem:[#allocation7 + $0x10] sm:$0xff] (!%p2145_p5)   ;;  %v2147_v34 = vcombine.low (!%p2145_p5), %v3334_v2, %v3336_v3  ;;  %v2148_v35 = vcombine.low (!%p2145_p5), %v3338_v4, %v3340_v5  ;;  %v2149_v39 = vcombine.low (!%p2145_p5), %v3342_v6, %v3344_v7 }
  0xce   : > { %564 = sbr.rel (%p2145_p5) target bundleno = 695 (0x2b7), region = 96  ;;  %2336 = vmatprep.subr.bf16.mxu0 (!%p2145_p5), %v2698_v16  ;;  %v2701_v20 = vld [vmem:[#allocation7 + $0x18] sm:$0xff] (!%p2145_p5)   ;;  %v2706_v21 = vld [vmem:[#allocation10] sm:$0xff] (!%p2145_p5)   ;;  %v2707_v22 = vld [vmem:[#allocation10 + $0x8] sm:$0xff] (!%p2145_p5)   ;;  %v2150_v40 = vcombine.low (!%p2145_p5), %v3346_v8, %v3348_v9  ;;  %v2151_v45 = vcombine.low (!%p2145_p5), %v3350_v10, %v3352_v11  ;;  %v2152_v46 = vcombine.low (!%p2145_p5), %v3354_v12, %v3356_v13  ;;  %v2153_v50 = vcombine.low (!%p2145_p5), %v3358_v14, %v3360_v15 }
  0xcf   : > { %2352 = vmatprep.mubr.bf16.mxu0 (!%p2145_p5), %v2146_v17  ;;  %2337 = vmatpush3.bf16.msra.mxu0 (!%p2145_p5), %v2698_v16  ;;  %v2702_v23 = vld [vmem:[#allocation7 + $0x20] sm:$0xff] (!%p2145_p5)   ;;  %v2708_v24 = vld [vmem:[#allocation10 + $0x10] sm:$0xff] (!%p2145_p5)   ;;  %v2703_v25 = vld [vmem:[#allocation7 + $0x28] sm:$0xff] (!%p2145_p5)  }
  0xd0   : > { %2338 = vmatprep.subr.bf16.mxu0 (!%p2145_p5), %v2699_v18  ;;  %2368 = vmatprep.subr.bf16.mxu1 (!%p2145_p5), %v2706_v21  ;;  %v2709_v26 = vld [vmem:[#allocation10 + $0x18] sm:$0xff] (!%p2145_p5)   ;;  %v2704_v27 = vld [vmem:[#allocation7 + $0x30] sm:$0xff] (!%p2145_p5)   ;;  %v2717_v28 = vld [vmem:[#allocation7] sm:$0xff] (!%p2145_p5)  }
  0xd1   : > { %2369 = vmatpush3.bf16.msra.mxu1 (!%p2145_p5), %v2706_v21  ;;  %v2710_v29 = vld [vmem:[#allocation10 + $0x20] sm:$0xff] (!%p2145_p5)   ;;  %2384 = vmatprep.mubr.bf16.mxu1 (!%p2145_p5), %v2717_v28  ;;  %v2705_v30 = vld [vmem:[#allocation7 + $0x38] sm:$0xff] (!%p2145_p5)   ;;  %v2712_v31 = vld [vmem:[#allocation10 + $0x28] sm:$0xff] (!%p2145_p5)  }
  0xd2   : > { %2370 = vmatprep.subr.bf16.mxu1 (!%p2145_p5), %v2707_v22  ;;  %v2711_v32 = vld [vmem:[#allocation9] sm:$0xff] (!%p2145_p5)   ;;  %v2714_v33 = vld [vmem:[#allocation10 + $0x30] sm:$0xff] (!%p2145_p5)   ;;  %v2713_v36 = vld [vmem:[#allocation9 + $0x8] sm:$0xff] (!%p2145_p5)  }
  0xd3   : > { %2339 = vmatpush3.bf16.msra.mxu0 (!%p2145_p5), %v2699_v18  ;;  %v2716_v37 = vld [vmem:[#allocation10 + $0x38] sm:$0xff] (!%p2145_p5)   ;;  %v2715_v38 = vld [vmem:[#allocation9 + $0x10] sm:$0xff] (!%p2145_p5)   ;;  %v2719_v42 = vld [vmem:[#allocation7 + $0x8] sm:$0xff] (!%p2145_p5)  }
  0xd4   : > { %2340 = vmatprep.subr.bf16.mxu0 (!%p2145_p5), %v2700_v19  ;;  %v2718_v41 = vld [vmem:[#allocation9 + $0x18] sm:$0xff] (!%p2145_p5)   ;;  %v2721_v43 = vld [vmem:[#allocation7 + $0x10] sm:$0xff] (!%p2145_p5)   ;;  %v2720_v44 = vld [vmem:[#allocation9 + $0x20] sm:$0xff] (!%p2145_p5)  }
  0xd5   : > { %2371 = vmatpush3.bf16.msra.mxu1 %v2707_v22  ;;  %v2722_v47 = vld [vmem:[#allocation9 + $0x28] sm:$0xff]   ;;  %v2723_v48 = vld [vmem:[#allocation7 + $0x18] sm:$0xff]   ;;  %v2724_v49 = vld [vmem:[#allocation9 + $0x30] sm:$0xff]  }
  0xd6   : > { %2372 = vmatprep.subr.bf16.mxu1 %v2708_v24  ;;  %v2725_v51 = vld [vmem:[#allocation7 + $0x20] sm:$0xff]   ;;  %v2726_v52 = vld [vmem:[#allocation9 + $0x38] sm:$0xff]   ;;  %v2727_v53 = vld [vmem:[#allocation7 + $0x28] sm:$0xff]  }
  0xd7   : > { %2341 = vmatpush3.bf16.msra.mxu0 %v2700_v19  ;;  %v2728_v54 = vld [vmem:[#allocation7 + $0x30] sm:$0xff]   ;;  %v2729_v55 = vld [vmem:[#allocation7 + $0x38] sm:$0xff]  }
  0xd8   : > { %2342 = vmatprep.subr.bf16.mxu0 %v2701_v20 }
  0xd9   : > { %2373 = vmatpush3.bf16.msra.mxu1 %v2708_v24 }
  0xda   : > { %2374 = vmatprep.subr.bf16.mxu1 %v2709_v26 }
  0xdb   : > { %2343 = vmatpush3.bf16.msra.mxu0 %v2701_v20 }
  0xdc   : > { %2344 = vmatprep.subr.bf16.mxu0 %v2702_v23 }
  0xdd   : > { %2375 = vmatpush3.bf16.msra.mxu1 %v2709_v26 }
  0xde   : > { %2376 = vmatprep.subr.bf16.mxu1 %v2710_v29 }
  0xdf   : > { %2345 = vmatpush3.bf16.msra.mxu0 %v2702_v23 }
  0xe0   : > { %2346 = vmatprep.subr.bf16.mxu0 %v2703_v25 }
  0xe1   : > { %2377 = vmatpush3.bf16.msra.mxu1 %v2710_v29 }
  0xe2   : > { %2378 = vmatprep.subr.bf16.mxu1 %v2712_v31 }
  0xe3   : > { %2347 = vmatpush3.bf16.msra.mxu0 %v2703_v25 }
  0xe4   : > { %2348 = vmatprep.subr.bf16.mxu0 %v2704_v27 }
  0xe5   : > { %2379 = vmatpush3.bf16.msra.mxu1 %v2712_v31 }
  0xe6   : > { %2380 = vmatprep.subr.bf16.mxu1 %v2714_v33 }
  0xe7   : > { %2349 = vmatpush3.bf16.msra.mxu0 %v2704_v27 }
  0xe8   : > { %2350 = vmatprep.subr.bf16.mxu0 %v2705_v30 }
  0xe9   : > { %2381 = vmatpush3.bf16.msra.mxu1 %v2714_v33 }
  0xea   : > { %2382 = vmatprep.subr.bf16.mxu1 %v2716_v37 }
  0xeb   : > { %2351 = vmatpush3.bf16.msra.mxu0 %v2705_v30 }
  0xec   : > { %2400 = vmatprep.subr.bf16.mxu0 %v2711_v32 }
  0xed   : > { %2383 = vmatpush3.bf16.msra.mxu1 %v2716_v37 }
  0xee   : > { %2353 = vmatmul.mubr.bf16.vlgmr.msra.gmra.mrb[0].mxu0 %v2147_v34  ;;  %2554 = vmatprep.subr.bf16.mxu1 %v2711_v32 }
  0xef   : > { %2356 = vmatprep.mubr.bf16.mxu0 %v2148_v35  ;;  %2401 = vmatpush3.bf16.msra.mxu0 %v2711_v32 }
  0xf0   : > { %2402 = vmatprep.subr.bf16.mxu0 %v2713_v36  ;;  %2385 = vmatmul.mubr.bf16.vlgmr.msra.gmra.mrb[0].mxu1 %v2719_v42 }
  0xf1   : > { %2562 = vmatpush3.bf16.msra.mxu1 %v2711_v32  ;;  %2388 = vmatprep.mubr.bf16.mxu1 %v2721_v43 }
  0xf2   : > { %2555 = vmatprep.subr.bf16.mxu1 %v2713_v36 }
  0xf3   : > { %2403 = vmatpush3.bf16.msra.mxu0 %v2713_v36 }
  0xf4   : > { %2404 = vmatprep.subr.bf16.mxu0 %v2715_v38 }
  0xf5   : > { %2563 = vmatpush3.bf16.msra.mxu1 %v2713_v36 }
  0xf6   : > { %2357 = vmatmul.mubr.bf16.gmra.mrb[4].mxu0 %v2149_v39  ;;  %2556 = vmatprep.subr.bf16.mxu1 %v2715_v38 }
  0xf7   : > { %2360 = vmatprep.mubr.bf16.mxu0 %v2150_v40  ;;  %2405 = vmatpush3.bf16.msra.mxu0 %v2715_v38 }
  0xf8   : > { %2406 = vmatprep.subr.bf16.mxu0 %v2718_v41  ;;  %2389 = vmatmul.mubr.bf16.gmra.mrb[4].mxu1 %v2723_v48  ;;  %v3030_v48 = vmov 0.0|0.0  }
  0xf9   : > { %2564 = vmatpush3.bf16.msra.mxu1 %v2715_v38  ;;  %2392 = vmatprep.mubr.bf16.mxu1 %v2725_v51  ;;  %1240 = vst [vmem:[#allocation2 + $0x8] sm:$0xff] %v3030_v48  ;;  %1241 = vst [vmem:[#allocation2 + $0x10] sm:$0xff] %v3030_v48  ;;  %v2186_v51 = vld [vmem:[%s3489_s4] ss:$0 sm:$0xff] }
  0xfa   : > { %2557 = vmatprep.subr.bf16.mxu1 %v2718_v41  ;;  %1242 = vst [vmem:[#allocation2 + $0x18] sm:$0xff] %v3030_v48  ;;  %1243 = vst [vmem:[#allocation2 + $0x20] sm:$0xff] %v3030_v48 }
  0xfb   : > { %2407 = vmatpush3.bf16.msra.mxu0 %v2718_v41  ;;  %1244 = vst [vmem:[#allocation2 + $0x28] sm:$0xff] %v3030_v48  ;;  %1245 = vst [vmem:[#allocation2 + $0x30] sm:$0xff] %v3030_v48 }
  0xfc   : > { %2408 = vmatprep.subr.bf16.mxu0 %v2720_v44  ;;  %1246 = vst [vmem:[#allocation2 + $0x38] sm:$0xff] %v3030_v48 }
  0xfd   : > { %2565 = vmatpush3.bf16.msra.mxu1 %v2718_v41 }
  0xfe   : > { %2361 = vmatmul.mubr.bf16.gmra.mrb[8].mxu0 %v2151_v45  ;;  %2558 = vmatprep.subr.bf16.mxu1 %v2720_v44 }
  0xff   : > { %2364 = vmatprep.mubr.bf16.mxu0 %v2152_v46  ;;  %2409 = vmatpush3.bf16.msra.mxu0 %v2720_v44 }
 0x100   : > { %2410 = vmatprep.subr.bf16.mxu0 %v2722_v47  ;;  %2393 = vmatmul.mubr.bf16.gmra.mrb[8].mxu1 %v2727_v53 }
 0x101   : > { %2566 = vmatpush3.bf16.msra.mxu1 %v2720_v44  ;;  %2396 = vmatprep.mubr.bf16.mxu1 %v2728_v54 }
 0x102   : > { %2559 = vmatprep.subr.bf16.mxu1 %v2722_v47 }
 0x103   : > { %2411 = vmatpush3.bf16.msra.mxu0 %v2722_v47 }
 0x104   : > { %2412 = vmatprep.subr.bf16.mxu0 %v2724_v49 }
 0x105   : > { %2567 = vmatpush3.bf16.msra.mxu1 %v2722_v47 }
 0x106   : > { %2365 = vmatmul.mubr.bf16.gmra.mrb[12].mxu0 %v2153_v50  ;;  %2560 = vmatprep.subr.bf16.mxu1 %v2724_v49 }
 0x107   : > { %2413 = vmatpush3.bf16.msra.mxu0 %v2724_v49 }
 0x108   : > { %2414 = vmatprep.subr.bf16.mxu0 %v2726_v52  ;;  %2397 = vmatmul.mubr.bf16.gmra.mrb[12].mxu1 %v2729_v55 }
 0x109   : > { %2568 = vmatpush3.bf16.msra.mxu1 %v2724_v49 }
 0x10a   : > { %2561 = vmatprep.subr.bf16.mxu1 %v2726_v52 }
 0x10b   : > { %2415 = vmatpush3.bf16.msra.mxu0 %v2726_v52 }
 0x10d   : > { %2569 = vmatpush3.bf16.msra.mxu1 %v2726_v52 }
 0x1c1   : > { %v2354_v56 = vpop.f32.mrb[0].mxu0 }
 0x1c2   : > { %v711_v57 = vpop.f32.mrb[1].mxu0 }
 0x1c3   : > { %v2355_v58 = vpop.f32.mrb[2].mxu0  ;;  %v2386_v17 = vpop.f32.mrb[0].mxu1 }
 0x1c4   : > { %v795_v59 = vpack.c.bf16 %v2355_v58, %v2354_v56  ;;  %v714_v60 = vpop.f32.mrb[3].mxu0  ;;  %v964_v20 = vpop.f32.mrb[1].mxu1 }
 0x1c5   : > { %v794_v61 = vpack.c.bf16 %v714_v60, %v711_v57  ;;  %v2387_v22 = vpop.f32.mrb[2].mxu1 }
 0x1c6   : > { %v967_v23 = vpop.f32.mrb[3].mxu1 }
 0x1c7   : > { %2416 = vmatprep.mubr.bf16.mxu0 %v794_v61 }
 0x1c8   : > { %2417 = vmatmul.mubr.bf16.vlgmr.msra.gmra.mrb[16].mxu0 %v795_v59 }
 0x1c9   : > { %v2358_v62 = vpop.f32.mrb[4].mxu0 }
 0x1ca   : > { %v727_v63 = vpop.f32.mrb[5].mxu0 }
 0x1cb   : > { %v2359_v16 = vpop.f32.mrb[6].mxu0  ;;  %v2390_v27 = vpop.f32.mrb[4].mxu1 }
 0x1cc   : > { %v797_v18 = vpack.c.bf16 %v2359_v16, %v2358_v62  ;;  %v730_v19 = vpop.f32.mrb[7].mxu0  ;;  %v980_v30 = vpop.f32.mrb[5].mxu1 }
 0x1cd   : > { %v796_v21 = vpack.c.bf16 %v730_v19, %v727_v63  ;;  %v2391_v32 = vpop.f32.mrb[6].mxu1 }
 0x1ce   : > { %v983_v33 = vpop.f32.mrb[7].mxu1 }
 0x1cf   : > { %2420 = vmatprep.mubr.bf16.mxu0 %v796_v21 }
 0x1d0   : > { %2421 = vmatmul.mubr.bf16.gmra.mrb[20].mxu0 %v797_v18 }
 0x1d1   : > { %v2362_v24 = vpop.f32.mrb[8].mxu0 }
 0x1d2   : > { %v743_v25 = vpop.f32.mrb[9].mxu0 }
 0x1d3   : > { %v2363_v26 = vpop.f32.mrb[10].mxu0  ;;  %v2394_v40 = vpop.f32.mrb[8].mxu1 }
 0x1d4   : > { %v799_v28 = vpack.c.bf16 %v2363_v26, %v2362_v24  ;;  %v746_v29 = vpop.f32.mrb[11].mxu0  ;;  %v996_v41 = vpop.f32.mrb[9].mxu1 }
 0x1d5   : > { %v798_v31 = vpack.c.bf16 %v746_v29, %v743_v25  ;;  %v2395_v42 = vpop.f32.mrb[10].mxu1 }
 0x1d6   : > { %v999_v43 = vpop.f32.mrb[11].mxu1 }
 0x1d7   : > { %2424 = vmatprep.mubr.bf16.mxu1 %v798_v31 }
 0x1d8   : > { %2425 = vmatmul.mubr.bf16.vlgmr.msra.gmra.mrb[16].mxu1 %v799_v28 }
 0x1d9   : > { %v2366_v34 = vpop.f32.mrb[12].mxu0 }
 0x1da   : > { %v759_v35 = vpop.f32.mrb[13].mxu0 }
 0x1db   : > { %v2367_v36 = vpop.f32.mrb[14].mxu0  ;;  %v2398_v44 = vpop.f32.mrb[12].mxu1 }
 0x1dc   : > { %v801_v37 = vpack.c.bf16 %v2367_v36, %v2366_v34  ;;  %v762_v38 = vpop.f32.mrb[15].mxu0  ;;  %v1012_v45 = vpop.f32.mrb[13].mxu1 }
 0x1dd   : > { %v800_v39 = vpack.c.bf16 %v762_v38, %v759_v35  ;;  %v2399_v46 = vpop.f32.mrb[14].mxu1 }
 0x1de   : > { %v1015_v47 = vpop.f32.mrb[15].mxu1 }
 0x1df   : > { %2428 = vmatprep.mubr.bf16.mxu1 %v800_v39 }
 0x1e0   : > { %2429 = vmatmul.mubr.bf16.gmra.mrb[20].mxu1 %v801_v37 }
 0x29b   : > { %v2418_v49 = vpop.f32.mrb[16].mxu0 }
 0x29c   : > { %v1109_v50 = vpop.f32.mrb[17].mxu0 }
 0x29d   : > { %v1110_v52 = vadd.f32 %v1109_v50, %v964_v20  ;;  %v2419_v53 = vpop.f32.mrb[18].mxu0 }
 0x29e   : > { %v1112_v54 = vpop.f32.mrb[19].mxu0 }
 0x29f   : > { %v1179_v55 = vadd.f32 %v2186_v51, %v1110_v52  ;;  %v1113_v56 = vadd.f32 %v1112_v54, %v967_v23 }
 0x2a1   : > { %v1180_v57 = vadd.f32 %v2186_v51, %v1113_v56  ;;  %v1195_v58 = vmax.f32 %v1179_v55, 0.0 }
 0x2a3   : > { %v1196_v59 = vmax.f32 %v1180_v57, 0.0  ;;  %v2422_v60 = vpop.f32.mrb[20].mxu0 }
 0x2a4   : > { %v1125_v61 = vpop.f32.mrb[21].mxu0 }
 0x2a5   : > { %v1227_v62 = vpack.c.bf16 %v1196_v59, %v1195_v58  ;;  %v2423_v63 = vpop.f32.mrb[22].mxu0 }
 0x2a6   : > { %v1128_v16 = vpop.f32.mrb[23].mxu0 }
 0x2a7   : > { %1239 = vst [vmem:[#allocation2] sm:$0xff] %v1227_v62 }
 0x2ab   : > { %v2426_v17 = vpop.f32.mrb[16].mxu1 }
 0x2ac   : > { %v1141_v18 = vpop.f32.mrb[17].mxu1 }
 0x2ad   : > { %v2427_v19 = vpop.f32.mrb[18].mxu1 }
 0x2ae   : > { %v1144_v21 = vpop.f32.mrb[19].mxu1 }
 0x2b3   : > { %v2430_v22 = vpop.f32.mrb[20].mxu1 }
 0x2b4   : > { %v1157_v24 = vpop.f32.mrb[21].mxu1 }
 0x2b5   : > { %v2431_v20 = vpop.f32.mrb[22].mxu1 }
 0x2b6   : > { %v1160_v25 = vpop.f32.mrb[23].mxu1 }
 0x2b7 PF: > { %p1247_p3 = scmp.eq.s32.totalorder %s3011_s17, 1 }
 0x2b8   : > { %v3031_v23 = vmov (%p1247_p3), 0.0  }
 0x2b9   : > { %1252 = sbr.rel (!%p1247_p3) target bundleno = 704 (0x2c0), region = 100  ;;  %1253 = vst [vmem:[#allocation3] sm:$0xff] (%p1247_p3), %v3031_v23  ;;  %1254 = vst [vmem:[#allocation3 + $0x8] sm:$0xff] (%p1247_p3), %v3031_v23 }
 0x2c0 PF: > { %p2188_p0 = scmp.ne.s32.totalorder %s3011_s17, 1 }
 0x2c1   : > { %v1258_v26 = vld [vmem:[#allocation2] sm:$0xff] (!%p2188_p0)  ;;  %v3386_v27 = vld [vmem:[#allocation2 + $0x8] sm:$0xff] (!%p2188_p0)  ;;  %v2189_v28 = vcombine.low (!%p2188_p0), %v3330_v0, %v3332_v1  ;;  %v2730_v29 = vld [vmem:[#allocation13] sm:$0xff] (!%p2188_p0)   ;;  %v2190_v41 = vcombine.low (!%p2188_p0), %v3334_v2, %v3336_v3  ;;  %v2191_v42 = vcombine.low (!%p2188_p0), %v3338_v4, %v3340_v5  ;;  %v2192_v45 = vcombine.low (!%p2188_p0), %v3342_v6, %v3344_v7 }
 0x2c2   : > { %1257 = sbr.rel (%p2188_p0) target bundleno = 1399 (0x577), region = 104  ;;  %2432 = vmatprep.subr.bf16.mxu0 (!%p2188_p0), %v1258_v26  ;;  %2480 = vmatprep.mubr.bf16.mxu1 (!%p2188_p0), %v1258_v26  ;;  %v3391_v30 = vld [vmem:[#allocation2 + $0x10] sm:$0xff] (!%p2188_p0)  ;;  %v2732_v31 = vld [vmem:[#allocation13 + $0x8] sm:$0xff] (!%p2188_p0)   ;;  %v2734_v32 = vld [vmem:[#allocation13 + $0x10] sm:$0xff] (!%p2188_p0)   ;;  %v2193_v2 = vcombine.low (!%p2188_p0), %v3346_v8, %v3348_v9  ;;  %v2194_v5 = vcombine.low (!%p2188_p0), %v3350_v10, %v3352_v11  ;;  %v2195_v46 = vcombine.low (!%p2188_p0), %v3354_v12, %v3356_v13  ;;  %vm3033_vm0 = vmmov (!%p2188_p0), 0  }
 0x2c3   : > { %2433 = vmatpush3.bf16.msra.mxu0 (!%p2188_p0), %v1258_v26  ;;  %2448 = vmatprep.mubr.bf16.mxu0 (!%p2188_p0), %v2189_v28  ;;  %v3395_v33 = vld [vmem:[#allocation2 + $0x18] sm:$0xff] (!%p2188_p0)  ;;  %v2736_v0 = vld [vmem:[#allocation13 + $0x18] sm:$0xff] (!%p2188_p0)   ;;  %v3399_v1 = vld [vmem:[#allocation2 + $0x20] sm:$0xff] (!%p2188_p0)  ;;  %v2196_v8 = vcombine.low (!%p2188_p0), %v3358_v14, %v3360_v15  ;;  %v3032_v26 = vmov (!%p2188_p0), 0.0  }
 0x2c4   : > { %2434 = vmatprep.subr.bf16.mxu0 (!%p2188_p0), %v3386_v27  ;;  %2464 = vmatprep.subr.bf16.mxu1 (!%p2188_p0), %v2730_v29  ;;  %v2738_v34 = vld [vmem:[#allocation13 + $0x20] sm:$0xff] (!%p2188_p0)   ;;  %v3403_v35 = vld [vmem:[#allocation2 + $0x28] sm:$0xff] (!%p2188_p0)  ;;  %v2740_v36 = vld [vmem:[#allocation13 + $0x28] sm:$0xff] (!%p2188_p0)  }
 0x2c5   : > { %2465 = vmatpush3.bf16.msra.mxu1 (!%p2188_p0), %v2730_v29  ;;  %v3407_v37 = vld [vmem:[#allocation2 + $0x30] sm:$0xff] (!%p2188_p0)  ;;  %v2742_v38 = vld [vmem:[#allocation13 + $0x30] sm:$0xff] (!%p2188_p0)   ;;  %v3411_v39 = vld [vmem:[#allocation2 + $0x38] sm:$0xff] (!%p2188_p0) }
 0x2c6   : > { %2466 = vmatprep.subr.bf16.mxu1 (!%p2188_p0), %v2732_v31  ;;  %v2731_v40 = vld [vmem:[#allocation12] sm:$0xff] (!%p2188_p0)   ;;  %v2733_v43 = vld [vmem:[#allocation12 + $0x8] sm:$0xff] (!%p2188_p0)   ;;  %v2735_v44 = vld [vmem:[#allocation12 + $0x10] sm:$0xff] (!%p2188_p0)  }
 0x2c7   : > { %2435 = vmatpush3.bf16.msra.mxu0 (!%p2188_p0), %v3386_v27  ;;  %v2737_v3 = vld [vmem:[#allocation12 + $0x18] sm:$0xff] (!%p2188_p0)   ;;  %v2739_v4 = vld [vmem:[#allocation12 + $0x20] sm:$0xff] (!%p2188_p0)   ;;  %v2741_v6 = vld [vmem:[#allocation12 + $0x28] sm:$0xff] (!%p2188_p0)  }
 0x2c8   : > { %2436 = vmatprep.subr.bf16.mxu0 (!%p2188_p0), %v3391_v30  ;;  %v2743_v7 = vld [vmem:[#allocation12 + $0x30] sm:$0xff] (!%p2188_p0)   ;;  %v2744_v9 = vld [vmem:[#allocation13 + $0x38] sm:$0xff] (!%p2188_p0)  }
 0x2c9   : > { %2467 = vmatpush3.bf16.msra.mxu1 %v2732_v31  ;;  %v2745_v10 = vld [vmem:[#allocation12 + $0x38] sm:$0xff]  }
 0x2ca   : > { %2468 = vmatprep.subr.bf16.mxu1 %v2734_v32 }
 0x2cb   : > { %2437 = vmatpush3.bf16.msra.mxu0 %v3391_v30 }
 0x2cc   : > { %2438 = vmatprep.subr.bf16.mxu0 %v3395_v33 }
 0x2cd   : > { %2469 = vmatpush3.bf16.msra.mxu1 %v2734_v32 }
 0x2ce   : > { %2470 = vmatprep.subr.bf16.mxu1 %v2736_v0 }
 0x2cf   : > { %2439 = vmatpush3.bf16.msra.mxu0 %v3395_v33 }
 0x2d0   : > { %2440 = vmatprep.subr.bf16.mxu0 %v3399_v1 }
 0x2d1   : > { %2471 = vmatpush3.bf16.msra.mxu1 %v2736_v0 }
 0x2d2   : > { %2472 = vmatprep.subr.bf16.mxu1 %v2738_v34 }
 0x2d3   : > { %2441 = vmatpush3.bf16.msra.mxu0 %v3399_v1 }
 0x2d4   : > { %2442 = vmatprep.subr.bf16.mxu0 %v3403_v35 }
 0x2d5   : > { %2473 = vmatpush3.bf16.msra.mxu1 %v2738_v34 }
 0x2d6   : > { %2474 = vmatprep.subr.bf16.mxu1 %v2740_v36 }
 0x2d7   : > { %2443 = vmatpush3.bf16.msra.mxu0 %v3403_v35 }
 0x2d8   : > { %2444 = vmatprep.subr.bf16.mxu0 %v3407_v37 }
 0x2d9   : > { %2475 = vmatpush3.bf16.msra.mxu1 %v2740_v36 }
 0x2da   : > { %2476 = vmatprep.subr.bf16.mxu1 %v2742_v38 }
 0x2db   : > { %2445 = vmatpush3.bf16.msra.mxu0 %v3407_v37 }
 0x2dc   : > { %2446 = vmatprep.subr.bf16.mxu0 %v3411_v39 }
 0x2dd   : > { %2477 = vmatpush3.bf16.msra.mxu1 %v2742_v38 }
 0x2de   : > { %2478 = vmatprep.subr.bf16.mxu1 %v2744_v9 }
 0x2df   : > { %2447 = vmatpush3.bf16.msra.mxu0 %v3411_v39 }
 0x2e0   : > { %2496 = vmatprep.subr.bf16.mxu0 %v2731_v40 }
 0x2e1   : > { %2479 = vmatpush3.bf16.msra.mxu1 %v2744_v9 }
 0x2e2   : > { %2449 = vmatmul.mubr.bf16.vlgmr.msra.gmra.mrb[0].mxu0 %v2190_v41  ;;  %2570 = vmatprep.subr.bf16.mxu1 %v2731_v40 }
 0x2e3   : > { %2452 = vmatprep.mubr.bf16.mxu0 %v2191_v42  ;;  %2497 = vmatpush3.bf16.msra.mxu0 %v2731_v40 }
 0x2e4   : > { %2498 = vmatprep.subr.bf16.mxu0 %v2733_v43  ;;  %2481 = vmatmul.mubr.bf16.vlgmr.msra.gmra.mrb[0].mxu1 %v3386_v27 }
 0x2e5   : > { %2578 = vmatpush3.bf16.msra.mxu1 %v2731_v40  ;;  %2484 = vmatprep.mubr.bf16.mxu1 %v3391_v30 }
 0x2e6   : > { %2571 = vmatprep.subr.bf16.mxu1 %v2733_v43 }
 0x2e7   : > { %2499 = vmatpush3.bf16.msra.mxu0 %v2733_v43 }
 0x2e8   : > { %2500 = vmatprep.subr.bf16.mxu0 %v2735_v44 }
 0x2e9   : > { %2579 = vmatpush3.bf16.msra.mxu1 %v2733_v43 }
 0x2ea   : > { %2453 = vmatmul.mubr.bf16.gmra.mrb[4].mxu0 %v2192_v45  ;;  %2572 = vmatprep.subr.bf16.mxu1 %v2735_v44 }
 0x2eb   : > { %2456 = vmatprep.mubr.bf16.mxu0 %v2193_v2  ;;  %2501 = vmatpush3.bf16.msra.mxu0 %v2735_v44 }
 0x2ec   : > { %2502 = vmatprep.subr.bf16.mxu0 %v2737_v3  ;;  %2485 = vmatmul.mubr.bf16.gmra.mrb[4].mxu1 %v3395_v33 }
 0x2ed   : > { %2580 = vmatpush3.bf16.msra.mxu1 %v2735_v44  ;;  %2488 = vmatprep.mubr.bf16.mxu1 %v3399_v1 }
 0x2ee   : > { %2573 = vmatprep.subr.bf16.mxu1 %v2737_v3 }
 0x2ef   : > { %2503 = vmatpush3.bf16.msra.mxu0 %v2737_v3 }
 0x2f0   : > { %2504 = vmatprep.subr.bf16.mxu0 %v2739_v4 }
 0x2f1   : > { %2581 = vmatpush3.bf16.msra.mxu1 %v2737_v3 }
 0x2f2   : > { %2457 = vmatmul.mubr.bf16.gmra.mrb[8].mxu0 %v2194_v5  ;;  %2574 = vmatprep.subr.bf16.mxu1 %v2739_v4 }
 0x2f3   : > { %2460 = vmatprep.mubr.bf16.mxu0 %v2195_v46  ;;  %2505 = vmatpush3.bf16.msra.mxu0 %v2739_v4 }
 0x2f4   : > { %2506 = vmatprep.subr.bf16.mxu0 %v2741_v6  ;;  %2489 = vmatmul.mubr.bf16.gmra.mrb[8].mxu1 %v3403_v35  ;;  %v2213_v35 = vld [vmem:[%s3492_s7] ss:$0 sm:$0xff] }
 0x2f5   : > { %2582 = vmatpush3.bf16.msra.mxu1 %v2739_v4  ;;  %2492 = vmatprep.mubr.bf16.mxu1 %v3407_v37  ;;  %v2746_v4 = vld [vmem:[%s3493_s8] sm:$0xff]  }
 0x2f6   : > { %2575 = vmatprep.subr.bf16.mxu1 %v2741_v6 }
 0x2f7   : > { %2507 = vmatpush3.bf16.msra.mxu0 %v2741_v6 }
 0x2f8   : > { %2508 = vmatprep.subr.bf16.mxu0 %v2743_v7 }
 0x2f9   : > { %2583 = vmatpush3.bf16.msra.mxu1 %v2741_v6 }
 0x2fa   : > { %2461 = vmatmul.mubr.bf16.gmra.mrb[12].mxu0 %v2196_v8  ;;  %2576 = vmatprep.subr.bf16.mxu1 %v2743_v7 }
 0x2fb   : > { %2509 = vmatpush3.bf16.msra.mxu0 %v2743_v7 }
 0x2fc   : > { %2510 = vmatprep.subr.bf16.mxu0 %v2745_v10  ;;  %2493 = vmatmul.mubr.bf16.gmra.mrb[12].mxu1 %v3411_v39 }
 0x2fd   : > { %2584 = vmatpush3.bf16.msra.mxu1 %v2743_v7 }
 0x2fe   : > { %2577 = vmatprep.subr.bf16.mxu1 %v2745_v10 }
 0x2ff   : > { %2511 = vmatpush3.bf16.msra.mxu0 %v2745_v10 }
 0x301   : > { %2585 = vmatpush3.bf16.msra.mxu1 %v2745_v10 }
 0x302   : > { %2528 = vmatprep.subr.bf16.mxu1 %v3032_v26 }
 0x3b5   : > { %v2450_v11 = vpop.f32.mrb[0].mxu0 }
 0x3b6   : > { %v1348_v12 = vpop.f32.mrb[1].mxu0 }
 0x3b7   : > { %v2451_v13 = vpop.f32.mrb[2].mxu0  ;;  %v2482_v18 = vpop.f32.mrb[0].mxu1 }
 0x3b8   : > { %v1424_v14 = vpack.c.bf16 %v2451_v13, %v2450_v11  ;;  %v1351_v15 = vpop.f32.mrb[3].mxu0  ;;  %v1545_v19 = vpop.f32.mrb[1].mxu1  ;;  %v1816_v13 = vld [vmem:[#allocation3] sm:$0xff] }
 0x3b9   : > { %v1423_v47 = vpack.c.bf16 %v1351_v15, %v1348_v12  ;;  %v2483_v21 = vpop.f32.mrb[2].mxu1  ;;  %v1817_v15 = vld [vmem:[#allocation3 + $0x8] sm:$0xff] }
 0x3ba   : > { %v1548_v22 = vpop.f32.mrb[3].mxu1 }
 0x3bb   : > { %2512 = vmatprep.mubr.bf16.mxu0 %v1423_v47 }
 0x3bc   : > { %2513 = vmatmul.mubr.bf16.vlgmr.msra.gmra.mrb[16].mxu0 %v1424_v14 }
 0x3bd   : > { %v2454_v48 = vpop.f32.mrb[4].mxu0 }
 0x3be   : > { %v1364_v49 = vpop.f32.mrb[5].mxu0 }
 0x3bf   : > { %v2455_v50 = vpop.f32.mrb[6].mxu0  ;;  %v2486_v24 = vpop.f32.mrb[4].mxu1 }
 0x3c0   : > { %v1426_v51 = vpack.c.bf16 %v2455_v50, %v2454_v48  ;;  %v1367_v52 = vpop.f32.mrb[7].mxu0  ;;  %v1561_v20 = vpop.f32.mrb[5].mxu1 }
 0x3c1   : > { %v1425_v53 = vpack.c.bf16 %v1367_v52, %v1364_v49  ;;  %v2487_v25 = vpop.f32.mrb[6].mxu1 }
 0x3c2   : > { %v1564_v23 = vpop.f32.mrb[7].mxu1 }
 0x3c3   : > { %2516 = vmatprep.mubr.bf16.mxu0 %v1425_v53 }
 0x3c4   : > { %2517 = vmatmul.mubr.bf16.gmra.mrb[20].mxu0 %v1426_v51 }
 0x3c5   : > { %v2458_v54 = vpop.f32.mrb[8].mxu0 }
 0x3c6   : > { %v1380_v55 = vpop.f32.mrb[9].mxu0 }
 0x3c7   : > { %v2459_v56 = vpop.f32.mrb[10].mxu0  ;;  %v2490_v27 = vpop.f32.mrb[8].mxu1 }
 0x3c8   : > { %v1428_v57 = vpack.c.bf16 %v2459_v56, %v2458_v54  ;;  %v1383_v58 = vpop.f32.mrb[11].mxu0  ;;  %v1577_v28 = vpop.f32.mrb[9].mxu1 }
 0x3c9   : > { %v1427_v59 = vpack.c.bf16 %v1383_v58, %v1380_v55  ;;  %v2491_v29 = vpop.f32.mrb[10].mxu1 }
 0x3ca   : > { %v1580_v30 = vpop.f32.mrb[11].mxu1 }
 0x3cb   : > { %2520 = vmatprep.mubr.bf16.mxu0 %v1427_v59 }
 0x3cc   : > { %2521 = vmatmul.mubr.bf16.gmra.mrb[24].mxu0 %v1428_v57 }
 0x3cd   : > { %v2462_v60 = vpop.f32.mrb[12].mxu0 }
 0x3ce   : > { %v1396_v61 = vpop.f32.mrb[13].mxu0 }
 0x3cf   : > { %v2463_v62 = vpop.f32.mrb[14].mxu0  ;;  %v2494_v31 = vpop.f32.mrb[12].mxu1 }
 0x3d0   : > { %v1430_v63 = vpack.c.bf16 %v2463_v62, %v2462_v60  ;;  %v1399_v16 = vpop.f32.mrb[15].mxu0  ;;  %v1593_v32 = vpop.f32.mrb[13].mxu1 }
 0x3d1   : > { %v1429_v17 = vpack.c.bf16 %v1399_v16, %v1396_v61  ;;  %v2495_v33 = vpop.f32.mrb[14].mxu1 }
 0x3d2   : > { %v1596_v0 = vpop.f32.mrb[15].mxu1 }
 0x3d3   : > { %2524 = vmatprep.mubr.bf16.mxu1 %v1429_v17 }
 0x3d4   : > { %2525 = vmatmul.mubr.bf16.vlgmr.msra.gmra.mrb[16].mxu1 %v1430_v63 }
 0x3d5   : > { %2530 = vmatprep.mubr.msk.bf16.mxu1 %vm3033_vm0, %v3032_v26 }
 0x48f   : > { %v2514_v1 = vpop.f32.mrb[16].mxu0 }
 0x490   : > { %v1690_v34 = vpop.f32.mrb[17].mxu0 }
 0x491   : > { %v1691_v36 = vadd.f32 %v1690_v34, %v1545_v19  ;;  %v2515_v37 = vpop.f32.mrb[18].mxu0 }
 0x492   : > { %v1693_v38 = vpop.f32.mrb[19].mxu0 }
 0x493   : > { %v1760_v39 = vadd.f32 %v2213_v35, %v1691_v36  ;;  %v1694_v40 = vadd.f32 %v1693_v38, %v1548_v22 }
 0x495   : > { %v1761_v41 = vadd.f32 %v2213_v35, %v1694_v40  ;;  %v1776_v42 = vmax.f32 %v1760_v39, 0.0 }
 0x497   : > { %v1777_v43 = vmax.f32 %v1761_v41, 0.0  ;;  %v2518_v44 = vpop.f32.mrb[20].mxu0 }
 0x498   : > { %v1706_v45 = vpop.f32.mrb[21].mxu0 }
 0x499   : > { %v1808_v2 = vpack.c.bf16 %v1777_v43, %v1776_v42  ;;  %v2519_v3 = vpop.f32.mrb[22].mxu0 }
 0x49a   : > { %v1709_v5 = vpop.f32.mrb[23].mxu0 }
 0x49b   : > { %2529 = vmatpush3.bf16.msra.mxu1 %v1808_v2 }
 0x49e   : > { %2531 = vmatmul.mubr.bf16.vlgmr.msra.gmra.mrb[20].mxu1 %v2746_v4 }
 0x49f   : > { %v2522_v46 = vpop.f32.mrb[24].mxu0 }
 0x4a0   : > { %v1722_v6 = vpop.f32.mrb[25].mxu0 }
 0x4a1   : > { %v2523_v7 = vpop.f32.mrb[26].mxu0 }
 0x4a2   : > { %v1725_v8 = vpop.f32.mrb[27].mxu0 }
 0x4a7   : > { %v2526_v9 = vpop.f32.mrb[16].mxu1 }
 0x4a8   : > { %v1738_v10 = vpop.f32.mrb[17].mxu1 }
 0x4a9   : > { %v2527_v11 = vpop.f32.mrb[18].mxu1 }
 0x4aa   : > { %v1741_v12 = vpop.f32.mrb[19].mxu1 }
 0x571   : > { %v1860_v14 = vpop.f32.mrb[20].mxu1 }
 0x572   : > { %v1867_v47 = vadd.f32 %v1860_v14, %v1816_v13  ;;  %v2532_v48 = vpop.f32.mrb[21].mxu1 }
 0x573   : > { %v1863_v49 = vpop.f32.mrb[22].mxu1 }
 0x574   : > { %1869 = vst [vmem:[#allocation3] sm:$0xff] %v1867_v47  ;;  %v1868_v50 = vadd.f32 %v1863_v49, %v1817_v15  ;;  %v2533_v51 = vpop.f32.mrb[23].mxu1 }
 0x576   : > { %1870 = vst [vmem:[#allocation3 + $0x8] sm:$0xff] %v1868_v50 }
 0x577 PF: > { %1872 = sbr.rel (!%p1247_p3) target bundleno = 1649 (0x671), region = 108  ;;  %v2747_v52 = vld [vmem:[#allocation15] sm:$0xff] (%p1247_p3)   ;;  %v3034_v53 = vmov (%p1247_p3), 0.0   ;;  %v2748_v54 = vld [vmem:[#allocation15 + $0x8] sm:$0xff] (%p1247_p3)   ;;  %vm3035_vm1 = vmmov (%p1247_p3), 0   ;;  %v2749_v55 = vld [vmem:[#allocation15 + $0x10] sm:$0xff] (%p1247_p3)  }
 0x578   : > { %2534 = vmatprep.subr.bf16.mxu0 (%p1247_p3), %v3034_v53  ;;  %2550 = vmatprep.mubr.msk.bf16.mxu0 (%p1247_p3), %vm3035_vm1, %v3034_v53  ;;  %v2750_v56 = vld [vmem:[#allocation15 + $0x18] sm:$0xff] (%p1247_p3)   ;;  %v2751_v57 = vld [vmem:[#allocation15 + $0x20] sm:$0xff] (%p1247_p3)   ;;  %v2752_v58 = vld [vmem:[#allocation15 + $0x28] sm:$0xff] (%p1247_p3)  }
 0x579   : > { %2535 = vmatpush3.bf16.msra.mxu0 (%p1247_p3), %v2747_v52  ;;  %v2753_v59 = vld [vmem:[#allocation15 + $0x30] sm:$0xff] (%p1247_p3)   ;;  %v2754_v60 = vld [vmem:[#allocation15 + $0x38] sm:$0xff] (%p1247_p3)  }
 0x57a   : > { %2536 = vmatprep.subr.bf16.mxu0 (%p1247_p3), %v3034_v53  ;;  %v2215_v16 = vld [vmem:[%s3495_s10] ss:$0 sm:$0xff] (%p1247_p3) }
 0x57b   : > { %v1873_v61 = vld [vmem:[#allocation3] sm:$0xff] (%p1247_p3) }
 0x57d   : > { %2537 = vmatpush3.bf16.msra.mxu0 (%p1247_p3), %v2748_v54  ;;  %v1874_v62 = vld [vmem:[#allocation3 + $0x8] sm:$0xff] (%p1247_p3) }
 0x57e   : > { %2538 = vmatprep.subr.bf16.mxu0 %v3034_v53  ;;  %v1875_v63 = vpack.c.bf16 %v1874_v62, %v1873_v61 }
 0x581   : > { %2539 = vmatpush3.bf16.msra.mxu0 %v2749_v55 }
 0x582   : > { %2540 = vmatprep.subr.bf16.mxu0 %v3034_v53 }
 0x585   : > { %2541 = vmatpush3.bf16.msra.mxu0 %v2750_v56 }
 0x586   : > { %2542 = vmatprep.subr.bf16.mxu0 %v3034_v53 }
 0x589   : > { %2543 = vmatpush3.bf16.msra.mxu0 %v2751_v57 }
 0x58a   : > { %2544 = vmatprep.subr.bf16.mxu0 %v3034_v53 }
 0x58d   : > { %2545 = vmatpush3.bf16.msra.mxu0 %v2752_v58 }
 0x58e   : > { %2546 = vmatprep.subr.bf16.mxu0 %v3034_v53 }
 0x591   : > { %2547 = vmatpush3.bf16.msra.mxu0 %v2753_v59 }
 0x592   : > { %2548 = vmatprep.subr.bf16.mxu0 %v3034_v53 }
 0x595   : > { %2549 = vmatpush3.bf16.msra.mxu0 %v2754_v60 }
 0x598   : > { %2551 = vmatmul.mubr.bf16.vlgmr.msra.gmra.mrb[0].mxu0 %v1875_v63 }
 0x66b   : > { %v1981_v17 = vpop.f32.mrb[0].mxu0 }
 0x66c   : > { %v1982_v18 = vadd.f32 %v2215_v16, %v1981_v17  ;;  %v2552_v19 = vpop.f32.mrb[1].mxu0 }
 0x66d   : > { %v1984_v21 = vpop.f32.mrb[2].mxu0 }
 0x66e   : > { %1988 = vst [vmem:[#allocation16] sm:$0xff] %v1982_v18  ;;  %v1985_v22 = vadd.f32 %v2215_v16, %v1984_v21  ;;  %v2553_v24 = vpop.f32.mrb[3].mxu0 }
 0x670   : > { %1989 = vst [vmem:[#allocation16 + $0x8] sm:$0xff] %v1985_v22 }
 0x671 PF: > { %s3515_s1 = sld [smem:[#allocation22_spill]]  ;;  %s3036_s14 = smov [#allocation16]  }
 0x672   : > { %s1996_s23 = sshll.u32 %s3036_s14, 4  ;;  %s1997_s23 = int_to_ptr.vmem [resolvable:$true] %s1996_s23 }
 0x673   : > { %s2951_s28 = scalar_lea.vmem %s1997_s23, 256  ;;  %p2958_p9 = scmp.lt.s32.totalorder %s1997_s23, %s1997_s23 }
 0x674   : > { %p2952_p4 = scmp.ne.s32.totalorder %s1997_s23, %s2951_s28  ;;  %p2959_p10 = scmp.lt.s32.totalorder %s2951_s28, %s2951_s28 }
 0x676   : > { %p2960_p11 = por %p2959_p10, %p2958_p9 }
 0x677   : > { %s3516_s3 = sadd.s32 4294967295, %s3515_s1  }
 0x678   : > { %p3450_p1 = scmp.eq.s32.totalorder %s3516_s3, 1 }
 0x67a   : > { %p2953_p6 = pnand %p2952_p4, %p3450_p1 }
 0x67c   : > { %p2954_p8 = pneg %p2953_p6 }
 0x67e   : > { %p2961_p12 = pnand %p2960_p11, %p2954_p8 }
 0x680   : > { %2964 = shalt.err (!%p2961_p12)
}
 0x681   : > { %s3518_s24 = sld [smem:[#allocation25_spill]] }
 0x687   : > { %s2965_s25 = scalar_lea.hbm %s3518_s24, 256 }
 0x688   : > { %p2966_p13 = scmp.ne.s32.totalorder %s3518_s24, %s2965_s25  ;;  %p2971_p5 = scmp.lt.u32.totalorder %s2965_s25, %s3518_s24 }
 0x68a   : > { %p2967_p2 = pnand %p2966_p13, %p3450_p1 }
 0x68c   : > { %p2968_p7 = pneg %p2967_p2 }
 0x68e   : > { %p2973_p3 = pnand %p2971_p5, %p2968_p7 }
 0x690   : > { %2976 = shalt.err (!%p2973_p3)
}
 0x691   : > { %s3037_s27 = smov 128   ;;  %s3038_s16 = smov 8  }
 0x692   : > { %2615 = dma.vmem_to_hbm [thread:$0]  (%p3450_p1), %s1997_s23, 256, %s3518_s24, [#allocation6], %s3037_s27, %s3037_s27, %s3038_s16  }
 0x693   : > { %3006 = dma.done.wait (%p3450_p1), [#allocation6], 256  }
 0x694   : > { %3008 = vsyncadd (%p3450_p1), [#allocation6], 4294967040 }
 0x695 PF: > { %s3519_s17 = sld [smem:[#allocation22_spill]] }
 0x69b   : > { %s26_s13 = sadd.s32 1, %s3519_s17   ;;  %s3520_s17 = smov %s3015_s18 }
 0x69c   : > { %p23_p0 = scmp.ge.s32.totalorder %s26_s13, 4   ;;  %s3521_s18 = smov %s3524_s19 }
 0x69d   : > { %s3522_s19 = smov %s26_s13 }
 0x69e   :  { %25 = sbr.rel (!%p23_p0) target bundleno = 10 (0xa), region = 140 }
 0x6a5   :  { %2012 = vsyncpa [#allocation5], 1 }
 0x6a6   :  { %2014 = vsyncpa [#allocation5 + $0x1], 1 }
 0x6a7   :  { %2015 = vsyncpa [#allocation8], 1 }
 0x6a8   :  { %2016 = vsyncpa [#allocation11], 1 }
 0x6a9   :  { %2017 = vsyncpa [#allocation14], 1 }
 0x6aa   :  { %2018 = vsyncpa [#allocation6], 1 }
 0x6ab   :  { %2020 = vsyncpa [#allocation6 + $0x1], 1 }

</bundles_post_ra>
